<compile_context>
chip_gen: v7x
topology: tpu7x:2x2x1
jax: 0.10.0
libtpu: 0.0.40
codegen_flags: <defaults>
</compile_context>

<pallas_src>
import functools

import jax
import jax.numpy as jnp
from jax.experimental import pallas as pl
from jax.experimental.pallas import tpu as pltpu

LANE = 128  # TPU lane width; channel/class dims are zero-padded to this.


# ----------------------------- Pallas kernel --------------------------------

def fused_forward_kernel(p_ref, wc_ref, bc_ref, wf_ref, bf_ref, o_ref, *, hw):
    """conv-as-matmul + bias + ReLU + mean-pool + FC for B_blk images per step.

    p_ref : (B_blk*HW, Kp)  bf16  im2col patches (batch folded into M)
    wc_ref: (Kp, 128)       bf16  conv weight (K and C_out zero-padded)
    bc_ref: (1, 128)        f32   conv bias (padded)
    wf_ref: (128, 128)      bf16  FC weight (padded)
    bf_ref: (1, 128)        f32   FC bias (padded)
    o_ref : (B_blk, 128)    f32   padded logits (lane-dense slab)
    """
    b_blk = o_ref.shape[0]
    conv = jnp.dot(p_ref[...], wc_ref[...],
                   preferred_element_type=jnp.float32)               # (B*HW, 128)
    act = jnp.maximum(conv + bc_ref[...], 0.0)                       # bias + ReLU
    # Global-average pool: per-image sum over the spatial axis on the VPU/XLU
    # (essentially free next to the conv matmul) + a single f32 1/HW scale.
    pooled = jnp.sum(act.reshape(b_blk, hw, LANE), axis=1) * (1.0 / hw)  # (B, 128)
    logits = jnp.dot(pooled.astype(jnp.bfloat16), wf_ref[...],
                     preferred_element_type=jnp.float32) + bf_ref[...]
    o_ref[...] = logits


# ------------------------------ Wrappers -----------------------------------

def _im2col_nhwc(x_nhwc, kh=3, kw=3):
    """3x3, stride 1, pad 1 patch extraction (glue, plain JAX). -> [N, H*W, K]."""
    n, h, w, c = x_nhwc.shape
    xp = jnp.pad(x_nhwc, ((0, 0), (1, 1), (1, 1), (0, 0)))
    cols = [xp[:, dh:dh + h, dw:dw + w, :] for dh in range(kh) for dw in range(kw)]
    patches = jnp.stack(cols, axis=3)            # [N, H, W, kh*kw, C]
    return patches.reshape(n, h * w, kh * kw * c)


def _pick_batch_block(n):
    """Largest sublane-dense (multiple-of-8) divisor of n that keeps >=2 grid
    steps (feeds both v7x TensorCores), capped at 64 images per step.
    Falls back to a single full-batch step for tiny/odd batches."""
    best = None
    for b in range(8, min(n // 2, 64) + 1, 8):
        if n % b == 0:
            best = b
    return best if best is not None else n


@jax.jit
def base_model_forward(x_nchw, params):
    """Forward pass: conv3x3(pad=1) -> ReLU -> GAP -> linear.

    x_nchw: [N, C_in, H, W] float32 (PyTorch convention).
    """
    n, c_in, h, w = x_nchw.shape
    hw = h * w
    c_out = params["w_conv"].shape[1]
    num_classes = params["w_fc"].shape[1]
    assert c_out <= LANE and num_classes <= LANE

    # bf16 im2col: half the pre-kernel HBM traffic; MXU operands are bf16 anyway.
    x_nhwc = jnp.transpose(x_nchw, (0, 2, 3, 1)).astype(jnp.bfloat16)  # NCHW->NHWC
    patches = _im2col_nhwc(x_nhwc)                                     # [N, HW, K]
    k = patches.shape[-1]
    kp = -(-k // 16) * 16            # bf16 sublane pad only (stays at 32, not 128)

    patches_p = jnp.pad(patches, ((0, 0), (0, 0), (0, kp - k))).reshape(n * hw, kp)
    wc_p = jnp.pad(params["w_conv"],
                   ((0, kp - k), (0, LANE - c_out))).astype(jnp.bfloat16)
    bc_p = jnp.pad(params["b_conv"], ((0, 0), (0, LANE - c_out)))      # f32
    wf_p = jnp.pad(params["w_fc"],
                   ((0, LANE - c_out), (0, LANE - num_classes))).astype(jnp.bfloat16)
    bf_p = jnp.pad(params["b_fc"], ((0, 0), (0, LANE - num_classes)))  # f32

    b_blk = _pick_batch_block(n)
    grid = (n // b_blk,)                                               # exact: no tail

    out = pl.pallas_call(
        functools.partial(fused_forward_kernel, hw=hw),
        out_shape=jax.ShapeDtypeStruct((n, LANE), jnp.float32),
        grid_spec=pltpu.PrefetchScalarGridSpec(
            num_scalar_prefetch=0,
            grid=grid,
            in_specs=[
                pl.BlockSpec((b_blk * hw, kp), lambda i: (i, 0)),
                pl.BlockSpec((kp, LANE), lambda i: (0, 0)),
                pl.BlockSpec((1, LANE), lambda i: (0, 0)),
                pl.BlockSpec((LANE, LANE), lambda i: (0, 0)),
                pl.BlockSpec((1, LANE), lambda i: (0, 0)),
            ],
            out_specs=pl.BlockSpec((b_blk, LANE), lambda i: (i, 0)),
        ),
        compiler_params=pltpu.CompilerParams(
            dimension_semantics=("parallel",),        # >=2 steps feeds both v7x TCs
            vmem_limit_bytes=32 * 1024 * 1024,
        ),
    )(patches_p, wc_p, bc_p, wf_p, bf_p)

    return out[:, :num_classes]                                        # [N, classes]


# ------------------------- Deterministic params -----------------------------

def init_params(key, c_in=3, c_out=8, num_classes=10, kh=3, kw=3):
    k1, k2, k3, k4 = jax.random.split(key, 4)
    # PyTorch conv weight is [C_out, C_in, kH, kW]; store it pre-reshaped to
    # im2col layout [(kh, kw, c_in), c_out] matching patch column ordering.
    w_conv_torch = jax.random.normal(k1, (c_out, c_in, kh, kw), jnp.float32) * 0.1
    w_conv = jnp.transpose(w_conv_torch, (2, 3, 1, 0)).reshape(kh * kw * c_in, c_out)
    b_conv = jax.random.normal(k2, (1, c_out), jnp.float32) * 0.1
    w_fc = jax.random.normal(k3, (c_out, num_classes), jnp.float32) * 0.1
    b_fc = jax.random.normal(k4, (1, num_classes), jnp.float32) * 0.1
    return {"w_conv": w_conv, "b_conv": b_conv, "w_fc": w_fc, "b_fc": b_fc}


# ------------------------------ Reference -----------------------------------

def reference_forward(x_nchw, params):
    """Pure-JAX f32 reference (lax conv) for correctness checking."""
    n, c_in, h, w = x_nchw.shape
    c_out = params["w_conv"].shape[1]
    x_nhwc = jnp.transpose(x_nchw, (0, 2, 3, 1))
    w_hwio = params["w_conv"].reshape(3, 3, c_in, c_out)
    conv = jax.lax.conv_general_dilated(
        x_nhwc, w_hwio, window_strides=(1, 1), padding="SAME",
        dimension_numbers=("NHWC", "HWIO", "NHWC"))
    conv = jnp.maximum(conv + params["b_conv"].reshape(1, 1, 1, c_out), 0.0)
    pooled = jnp.mean(conv.reshape(n, h * w, c_out), axis=1)
    return pooled @ params["w_fc"] + params["b_fc"]


# --------------------------------- Main --------------------------------------

if __name__ == "__main__":
    key = jax.random.PRNGKey(0)
    kx, kp = jax.random.split(key)

    # Small shapes consistent with input_size=(3,16,16); batch of 16 exercises
    # the batched (B_blk=8) grid with 2 parallel steps.
    N, C_IN, H, W = 16, 3, 16, 16
    x = jax.random.normal(kx, (N, C_IN, H, W), jnp.float32)
    params = init_params(kp, c_in=C_IN, c_out=8, num_classes=10)

    out = base_model_forward(x, params)
    out = jax.block_until_ready(out)

    ref = reference_forward(x, params)
    assert out.shape == (N, 10)
    # bf16 MXU operands (patches, conv weight, FC weight) vs. f32 reference
    # -> slightly looser tolerance.
    assert jnp.allclose(out, ref, atol=2e-2, rtol=2e-2), "mismatch vs reference"

    print("KERNEL_OK")
</pallas_src>

<mosaic_0001>
module attributes {stable_mosaic.version = 11 : i64} {
  func.func @fused_forward_kernel(%arg0: i32, %arg1: memref<2048x32xbf16, #tpu.memory_space<vmem>>, %arg2: memref<32x128xbf16, #tpu.memory_space<vmem>>, %arg3: memref<1x128xf32, #tpu.memory_space<vmem>>, %arg4: memref<128x128xbf16, #tpu.memory_space<vmem>>, %arg5: memref<1x128xf32, #tpu.memory_space<vmem>>, %arg6: memref<8x128xf32, #tpu.memory_space<vmem>>) attributes {dimension_semantics = [#tpu.dimension_semantics<parallel>], iteration_bounds = array<i64: 2>, scalar_prefetch = 0 : i64, scratch_operands = 0 : i64, tpu.core_type = #tpu.core_type<tc>, window_params = [{transform_indices = @transform_0, window_bounds = array<i64: 2048, 32>}, {pipeline_mode = #tpu.pipeline_mode<synchronous>, transform_indices = @transform_1, window_bounds = array<i64: 32, 128>}, {pipeline_mode = #tpu.pipeline_mode<synchronous>, transform_indices = @transform_2, window_bounds = array<i64: 1, 128>}, {pipeline_mode = #tpu.pipeline_mode<synchronous>, transform_indices = @transform_3, window_bounds = array<i64: 128, 128>}, {pipeline_mode = #tpu.pipeline_mode<synchronous>, transform_indices = @transform_4, window_bounds = array<i64: 1, 128>}, {transform_indices = @transform_5, window_bounds = array<i64: 8, 128>}]} {
    %c0 = arith.constant 0 : index
    %c0_0 = arith.constant 0 : index
    %0 = vector.load %arg1[%c0, %c0_0] : memref<2048x32xbf16, #tpu.memory_space<vmem>>, vector<2048x32xbf16>
    %c0_1 = arith.constant 0 : index
    %c0_2 = arith.constant 0 : index
    %1 = vector.load %arg2[%c0_1, %c0_2] : memref<32x128xbf16, #tpu.memory_space<vmem>>, vector<32x128xbf16>
    %cst = arith.constant dense<0.000000e+00> : vector<2048x128xf32>
    %2 = tpu.matmul %0, %1, %cst {dimension_numbers = #tpu.dot_dimension_numbers<[1], [0], [0], [1], [0, 0, 1, 1], [], []>} : vector<2048x32xbf16>, vector<32x128xbf16>, vector<2048x128xf32> -> vector<2048x128xf32>
    %c0_3 = arith.constant 0 : index
    %c0_4 = arith.constant 0 : index
    %3 = vector.load %arg3[%c0_3, %c0_4] : memref<1x128xf32, #tpu.memory_space<vmem>>, vector<1x128xf32>
    %4 = vector.broadcast %3 : vector<1x128xf32> to vector<2048x128xf32>
    %5 = arith.addf %2, %4 : vector<2048x128xf32>
    %cst_5 = arith.constant 0.000000e+00 : f32
    %6 = vector.broadcast %cst_5 : f32 to vector<2048x128xf32>
    %7 = arith.maximumf %5, %6 : vector<2048x128xf32>
    %8 = vector.shape_cast %7 : vector<2048x128xf32> to vector<8x256x128xf32>
    %cst_6 = arith.constant dense<0.000000e+00> : vector<8x128xf32>
    %9 = vector.multi_reduction <add>, %8, %cst_6 [1] : vector<8x256x128xf32> to vector<8x128xf32>
    %cst_7 = arith.constant 3.906250e-03 : f32
    %10 = vector.broadcast %cst_7 : f32 to vector<8x128xf32>
    %11 = arith.mulf %9, %10 : vector<8x128xf32>
    %12 = arith.truncf %11 : vector<8x128xf32> to vector<8x128xbf16>
    %c0_8 = arith.constant 0 : index
    %c0_9 = arith.constant 0 : index
    %13 = vector.load %arg4[%c0_8, %c0_9] : memref<128x128xbf16, #tpu.memory_space<vmem>>, vector<128x128xbf16>
    %cst_10 = arith.constant dense<0.000000e+00> : vector<8x128xf32>
    %14 = tpu.matmul %12, %13, %cst_10 {dimension_numbers = #tpu.dot_dimension_numbers<[1], [0], [0], [1], [0, 0, 1, 1], [], []>} : vector<8x128xbf16>, vector<128x128xbf16>, vector<8x128xf32> -> vector<8x128xf32>
    %c0_11 = arith.constant 0 : index
    %c0_12 = arith.constant 0 : index
    %15 = vector.load %arg5[%c0_11, %c0_12] : memref<1x128xf32, #tpu.memory_space<vmem>>, vector<1x128xf32>
    %16 = vector.broadcast %15 : vector<1x128xf32> to vector<8x128xf32>
    %17 = arith.addf %14, %16 : vector<8x128xf32>
    %c0_13 = arith.constant 0 : index
    %c0_14 = arith.constant 0 : index
    %18 = vector.load %arg6[%c0_13, %c0_14] : memref<8x128xf32, #tpu.memory_space<vmem>>, vector<8x128xf32>
    tpu.vector_store %arg6[%c0_13, %c0_14], %17 {strides = array<i32>} : memref<8x128xf32, #tpu.memory_space<vmem>>, vector<8x128xf32>,
    return
  }
  func.func @transform_0(%arg0: i32) -> (i32, i32) {
    %c0_i32 = arith.constant 0 : i32
    %c0_i32_0 = arith.constant 0 : i32
    return %arg0, %c0_i32 : i32, i32
  }
  func.func @transform_1(%arg0: i32) -> (i32, i32) {
    %c0_i32 = arith.constant 0 : i32
    %c0_i32_0 = arith.constant 0 : i32
    %c0_i32_1 = arith.constant 0 : i32
    return %c0_i32, %c0_i32_0 : i32, i32
  }
  func.func @transform_2(%arg0: i32) -> (i32, i32) {
    %c0_i32 = arith.constant 0 : i32
    %c0_i32_0 = arith.constant 0 : i32
    %c0_i32_1 = arith.constant 0 : i32
    return %c0_i32, %c0_i32_0 : i32, i32
  }
  func.func @transform_3(%arg0: i32) -> (i32, i32) {
    %c0_i32 = arith.constant 0 : i32
    %c0_i32_0 = arith.constant 0 : i32
    %c0_i32_1 = arith.constant 0 : i32
    return %c0_i32, %c0_i32_0 : i32, i32
  }
  func.func @transform_4(%arg0: i32) -> (i32, i32) {
    %c0_i32 = arith.constant 0 : i32
    %c0_i32_0 = arith.constant 0 : i32
    %c0_i32_1 = arith.constant 0 : i32
    return %c0_i32, %c0_i32_0 : i32, i32
  }
  func.func @transform_5(%arg0: i32) -> (i32, i32) {
    %c0_i32 = arith.constant 0 : i32
    %c0_i32_0 = arith.constant 0 : i32
    return %arg0, %c0_i32 : i32, i32
  }
}

</mosaic_0001>

<bundles_post_ra>
// kernel: base_model_forward.1
= control target key start
LH: loop header
LB: loop body
LE: loop exit
PB: predicated region body
PF: predicated region fallthrough
CT: control target
= control target key end

     0   :  { %10 = vsyncpa [#allocation3], 0  ;;  %s5132_s0 = inlined_call_operand.vmem [shape: bf16[4096,32], index: 0, kind: input, shape index: {}]   ;;  %s5133_s1 = inlined_call_operand.vmem [shape: bf16[32,128], index: 1, kind: input, shape index: {}]   ;;  %s5134_s2 = inlined_call_operand.vmem [shape: f32[1,128], index: 2, kind: input, shape index: {}]   ;;  %s5135_s3 = inlined_call_operand.vmem [shape: bf16[128,128], index: 3, kind: input, shape index: {}]   ;;  %s5136_s4 = inlined_call_operand.vmem [shape: f32[1,128], index: 4, kind: input, shape index: {}]   ;;  %s5137_s5 = inlined_call_operand.hbm [shape: f32[16,128], index: 5, kind: output, shape index: {}]  }
   0x1   :  { %12 = vsyncpa [#allocation3 + $0x1], 0  ;;  %s4352_s18 = smov 0   ;;  %s4354_s19 = smov 0  }
   0x2   :  { %s4356_s20 = smov 0   ;;  %s4358_s21 = smov 0  }
   0x3 LB: > { %s4373_s22 = sadd.s32 4294967295, %s4317_s21   ;;  %s3372_s23 = sadd.s32 4294967294, %s4317_s21   ;;  %s4317_s21 = sphi %s4358_s21, %s5143_s21   ;;  %s4313_s20 = sphi %s4356_s20, %s5142_s20   ;;  %s4309_s19 = sphi %s4354_s19, %s5141_s19   ;;  %s4305_s18 = sphi %s4352_s18, %s5140_s18  }
   0x4   : > { %s4377_s24 = sadd.s32 1, %s4317_s21   ;;  %s135_s25 = sadd.s32 1, %s4313_s20 }
   0x5   : > { %s132_s26 = ssub.s32 %s4317_s21, %s4377_s24  ;;  %p145_p0 = scmp.ne.s32.totalorder %s4313_s20, %s4309_s19 }
   0x6   : > { %p133_p1 = scmp.eq.s32.totalorder %s132_s26, 0  ;;  %p146_p2 = scmp.eq.s32.totalorder %s4373_s22, 1 }
   0x7   : > { %p151_p3 = scmp.ne.s32.totalorder %s4309_s19, %s4305_s18  ;;  %p152_p4 = scmp.eq.s32.totalorder %s3372_s23, 1 }
   0x8   : > { %s4388_s27 = scalar_select %p133_p1, %s4313_s20, %s135_s25  }
   0x9   : > { %p4390_p5 = por %p146_p2, %p145_p0  ;;  %p4394_p6 = por %p152_p4, %p151_p3 }
   0xa   : > { %p3375_p7 = scmp.ge.s32.totalorder %s4317_s21, 1  ;;  %p191_p8 = scmp.lt.s32.totalorder %s4317_s21, 3 }
   0xc   : > { %p192_p9 = pnand %p3375_p7, %p191_p8 }
   0xd   : > { %v4115_v0 = vld [vmem:[%s5133_s1] sm:$0xff] (!%p192_p9)   ;;  %s3377_s7 = sshll.u32 (!%p192_p9), %s4373_s22, 8  ;;  %v4116_v1 = vld [vmem:[%s5133_s1 + $0x8] sm:$0xff] (!%p192_p9)   ;;  %vm1145_vm0 = vcmask (!%p192_p9), 261120   ;;  %vm3194_vm1 = vcmask (!%p192_p9), 1041409   ;;  %vm4320_vm2 = vmmov (!%p192_p9), 0  }
   0xe   : > { %195 = sbr.rel (%p192_p9) target bundleno = 815 (0x32f), region = 40  ;;  %p220_p10 = scmp.lt.s32.totalorder (!%p192_p9), %s3377_s7, 511  ;;  %3790 = vmatprep.subr.bf16.mxu0 (!%p192_p9), %v4115_v0  ;;  %4070 = vmatprep.subr.bf16.mxu1 (!%p192_p9), %v4115_v0  ;;  %vm3196_vm3 = vcmask (!%p192_p9), 1042434   ;;  %vm3198_vm4 = vcmask (!%p192_p9), 1043459   ;;  %vm3200_vm5 = vcmask (!%p192_p9), 1044484   ;;  %vm3202_vm6 = vcmask (!%p192_p9), 1045509  }
   0xf   : > { %3791 = vmatpush3.bf16.msra.mxu0 (!%p192_p9), %v4115_v0  ;;  %4072 = vmatpush3.bf16.msra.mxu1 (!%p192_p9), %v4115_v0  ;;  %vm3204_vm7 = vcmask (!%p192_p9), 1046534   ;;  %vm3206_vm8 = vcmask (!%p192_p9), 1047559   ;;  %s216_s26 = sand.u32 (!%p192_p9), 1, %s4309_s19   ;;  %s3648_s8 = sshll.u32 (!%p192_p9), %s4373_s22, 7 }
  0x10   : > { %3792 = vmatprep.subr.bf16.mxu0 (!%p192_p9), %v4116_v1  ;;  %4071 = vmatprep.subr.bf16.mxu1 (!%p192_p9), %v4116_v1  ;;  %s3376_s30 = sshll.u32 (!%p192_p9), %s216_s26, 3  ;;  %s3300_s14 = scalar_lea.sflag (!%p192_p9), [#allocation3], %s216_s26 }
  0x11   : > { %s218_s9 = scalar_lea.vmem (!%p192_p9), [#allocation2], %s3376_s30  ;;  %s4321_s15 = smov (!%p192_p9), [#allocation2]  }
  0x12   : > { %s4259_s16 = sshll.u32 (!%p192_p9), %s4321_s15, 4  ;;  %s4260_s16 = int_to_ptr.vmem [resolvable:$false] %s4259_s16 }
  0x13   : > { %3793 = vmatpush3.bf16.msra.mxu0 (!%p192_p9), %v4116_v1  ;;  %4073 = vmatpush3.bf16.msra.mxu1 (!%p192_p9), %v4116_v1  ;;  %s4261_s17 = scalar_lea.vmem (!%p192_p9), %s4260_s16, 256 }
  0x15   : > { %s5145_s7 = smov (!%p220_p10, %s3377_s7), 511 }
  0x16   : > { %s3378_s10 = sshll.u32 %s5145_s7, 2 }
  0x17   : > { %s4410_s13 = scalar_lea.vmem %s5132_s0, %s3378_s10  ;;  %s3313_s10 = sshll.u32 %s218_s9, 4  ;;  %s5092_s10 = int_to_ptr.vmem [resolvable:$true] %s3313_s10 }
  0x18   : > { %v4117_v2 = vld [vmem:[%s4410_s13] sm:$0xff]   ;;  %v4118_v3 = vld [vmem:[%s4410_s13 + $0x8] sm:$0xff]   ;;  %v4119_v4 = vld [vmem:[%s4410_s13 + $0x10] sm:$0xff]   ;;  %s4255_s22 = scalar_lea.vmem %s5092_s10, 128  ;;  %p4262_p0 = scmp.lt.s32.totalorder %s5092_s10, %s4260_s16 }
  0x19   : > { %3794 = vmatprep.mubr.msk.bf16.mxu0 %vm1145_vm0, %v4117_v2  ;;  %v4120_v5 = vld [vmem:[%s4410_s13 + $0x18] sm:$0xff]   ;;  %v4121_v6 = vld [vmem:[%s4410_s13 + $0x20] sm:$0xff]   ;;  %v4122_v7 = vld [vmem:[%s4410_s13 + $0x28] sm:$0xff]   ;;  %p4256_p11 = scmp.ne.s32.totalorder %s5092_s10, %s4255_s22  ;;  %p4263_p1 = scmp.lt.s32.totalorder %s4261_s17, %s4255_s22 }
  0x1a   : > { %3795 = vmatmul.mubr.msk.bf16.vlgmr.msra.gmra.mrb[0].mxu0 %vm1145_vm0, %v4118_v3  ;;  %v4123_v8 = vld [vmem:[%s4410_s13 + $0x30] sm:$0xff]   ;;  %v4134_v10 = vld [vmem:[%s4410_s13 + $0x218] sm:$0xff]   ;;  %v4137_v11 = vld [vmem:[%s4410_s13 + $0x220] sm:$0xff]  }
  0x1b   : > { %3798 = vmatprep.mubr.msk.bf16.mxu0 %vm1145_vm0, %v4119_v4  ;;  %v4133_v9 = vld [vmem:[%s4410_s13 + $0x210] sm:$0xff]   ;;  %v4124_v12 = vld [vmem:[%s4410_s13 + $0x38] sm:$0xff]   ;;  %v4125_v13 = vld [vmem:[%s4410_s13 + $0x40] sm:$0xff]   ;;  %p4257_p12 = pnand %p4256_p11, %p4390_p5  ;;  %p4264_p2 = por %p4263_p1, %p4262_p0 }
  0x1c   : > { %3926 = vmatprep.mubr.msk.bf16.mxu1 %vm1145_vm0, %v4133_v9  ;;  %v4138_v14 = vld [vmem:[%s4410_s13 + $0x228] sm:$0xff]   ;;  %v4141_v15 = vld [vmem:[%s4410_s13 + $0x230] sm:$0xff]   ;;  %v4142_v18 = vld [vmem:[%s4410_s13 + $0x238] sm:$0xff]  }
  0x1d   : > { %3927 = vmatmul.mubr.msk.bf16.vlgmr.msra.gmra.mrb[0].mxu1 %vm1145_vm0, %v4134_v10  ;;  %v4126_v16 = vld [vmem:[%s4410_s13 + $0x48] sm:$0xff]   ;;  %v4127_v17 = vld [vmem:[%s4410_s13 + $0x50] sm:$0xff]   ;;  %v4145_v19 = vld [vmem:[%s4410_s13 + $0x240] sm:$0xff]   ;;  %p4258_p13 = pneg %p4257_p12 }
  0x1e   : > { %3930 = vmatprep.mubr.msk.bf16.mxu1 %vm1145_vm0, %v4137_v11  ;;  %v4128_v20 = vld [vmem:[%s4410_s13 + $0x58] sm:$0xff]   ;;  %v4129_v21 = vld [vmem:[%s4410_s13 + $0x60] sm:$0xff]   ;;  %v4146_v22 = vld [vmem:[%s4410_s13 + $0x248] sm:$0xff]  }
  0x1f   : > { %v4149_v23 = vld [vmem:[%s4410_s13 + $0x250] sm:$0xff]   ;;  %v4130_v24 = vld [vmem:[%s4410_s13 + $0x68] sm:$0xff]   ;;  %v4150_v26 = vld [vmem:[%s4410_s13 + $0x258] sm:$0xff]   ;;  %p4265_p3 = pnand %p4264_p2, %p4258_p13 }
  0x20   : > { %v4131_v25 = vld [vmem:[%s4410_s13 + $0x70] sm:$0xff]   ;;  %v4153_v27 = vld [vmem:[%s4410_s13 + $0x260] sm:$0xff]   ;;  %v4132_v28 = vld [vmem:[%s4410_s13 + $0x78] sm:$0xff]  }
  0x21   : > { %v4135_v29 = vld [vmem:[%s4410_s13 + $0x80] sm:$0xff]   ;;  %v4154_v30 = vld [vmem:[%s4410_s13 + $0x268] sm:$0xff]   ;;  %v4157_v31 = vld [vmem:[%s4410_s13 + $0x270] sm:$0xff]  }
  0x22   : > { %3799 = vmatmul.mubr.msk.bf16.gmra.mrb[4].mxu0 %vm1145_vm0, %v4120_v5  ;;  %v4136_v32 = vld [vmem:[%s4410_s13 + $0x88] sm:$0xff]   ;;  %v4139_v33 = vld [vmem:[%s4410_s13 + $0x90] sm:$0xff]   ;;  %v4158_v34 = vld [vmem:[%s4410_s13 + $0x278] sm:$0xff]  }
  0x23   : > { %3802 = vmatprep.mubr.msk.bf16.mxu0 %vm1145_vm0, %v4121_v6  ;;  %v4161_v35 = vld [vmem:[%s4410_s13 + $0x280] sm:$0xff]   ;;  %v4140_v36 = vld [vmem:[%s4410_s13 + $0x98] sm:$0xff]   ;;  %v4162_v38 = vld [vmem:[%s4410_s13 + $0x288] sm:$0xff]  }
  0x24   : > { %v4143_v37 = vld [vmem:[%s4410_s13 + $0xa0] sm:$0xff]   ;;  %v4165_v39 = vld [vmem:[%s4410_s13 + $0x290] sm:$0xff]   ;;  %v4144_v40 = vld [vmem:[%s4410_s13 + $0xa8] sm:$0xff]  }
  0x25   : > { %3931 = vmatmul.mubr.msk.bf16.gmra.mrb[4].mxu1 %vm1145_vm0, %v4138_v14  ;;  %v4147_v41 = vld [vmem:[%s4410_s13 + $0xb0] sm:$0xff]   ;;  %v4166_v42 = vld [vmem:[%s4410_s13 + $0x298] sm:$0xff]   ;;  %v4169_v43 = vld [vmem:[%s4410_s13 + $0x2a0] sm:$0xff]  }
  0x26   : > { %3934 = vmatprep.mubr.msk.bf16.mxu1 %vm1145_vm0, %v4141_v15  ;;  %v4148_v44 = vld [vmem:[%s4410_s13 + $0xb8] sm:$0xff]   ;;  %v4151_v45 = vld [vmem:[%s4410_s13 + $0xc0] sm:$0xff]   ;;  %v4170_v46 = vld [vmem:[%s4410_s13 + $0x2a8] sm:$0xff]  }
  0x27   : > { %v4173_v47 = vld [vmem:[%s4410_s13 + $0x2b0] sm:$0xff]   ;;  %v4152_v48 = vld [vmem:[%s4410_s13 + $0xc8] sm:$0xff]   ;;  %v4174_v50 = vld [vmem:[%s4410_s13 + $0x2b8] sm:$0xff]  }
  0x28   : > { %v4155_v49 = vld [vmem:[%s4410_s13 + $0xd0] sm:$0xff]   ;;  %v4177_v51 = vld [vmem:[%s4410_s13 + $0x2c0] sm:$0xff]   ;;  %v4156_v52 = vld [vmem:[%s4410_s13 + $0xd8] sm:$0xff]  }
  0x29   : > { %v4159_v53 = vld [vmem:[%s4410_s13 + $0xe0] sm:$0xff]   ;;  %v4178_v54 = vld [vmem:[%s4410_s13 + $0x2c8] sm:$0xff]   ;;  %v4181_v55 = vld [vmem:[%s4410_s13 + $0x2d0] sm:$0xff]  }
  0x2a   : > { %3803 = vmatmul.mubr.msk.bf16.gmra.mrb[8].mxu0 %vm1145_vm0, %v4122_v7  ;;  %v4160_v56 = vld [vmem:[%s4410_s13 + $0xe8] sm:$0xff]   ;;  %v4163_v57 = vld [vmem:[%s4410_s13 + $0xf0] sm:$0xff]   ;;  %v4182_v58 = vld [vmem:[%s4410_s13 + $0x2d8] sm:$0xff]  }
  0x2b   : > { %3806 = vmatprep.mubr.msk.bf16.mxu0 %vm1145_vm0, %v4123_v8  ;;  %v4185_v59 = vld [vmem:[%s4410_s13 + $0x2e0] sm:$0xff]   ;;  %v4164_v60 = vld [vmem:[%s4410_s13 + $0xf8] sm:$0xff]   ;;  %v4186_v62 = vld [vmem:[%s4410_s13 + $0x2e8] sm:$0xff]  }
  0x2c   : > { %v4167_v61 = vld [vmem:[%s4410_s13 + $0x100] sm:$0xff]   ;;  %v4189_v63 = vld [vmem:[%s4410_s13 + $0x2f0] sm:$0xff]   ;;  %v4168_v0 = vld [vmem:[%s4410_s13 + $0x108] sm:$0xff]  }
  0x2d   : > { %3935 = vmatmul.mubr.msk.bf16.gmra.mrb[8].mxu1 %vm1145_vm0, %v4142_v18  ;;  %v4190_v1 = vld [vmem:[%s4410_s13 + $0x2f8] sm:$0xff]   ;;  %v4171_v2 = vld [vmem:[%s4410_s13 + $0x110] sm:$0xff]   ;;  %v4193_v3 = vld [vmem:[%s4410_s13 + $0x300] sm:$0xff]  }
  0x2e   : > { %3938 = vmatprep.mubr.msk.bf16.mxu1 %vm1145_vm0, %v4145_v19  ;;  %v4172_v4 = vld [vmem:[%s4410_s13 + $0x118] sm:$0xff]   ;;  %v4194_v5 = vld [vmem:[%s4410_s13 + $0x308] sm:$0xff]   ;;  %v4175_v6 = vld [vmem:[%s4410_s13 + $0x120] sm:$0xff]  }
  0x2f   : > { %v4197_v7 = vld [vmem:[%s4410_s13 + $0x310] sm:$0xff]   ;;  %v4176_v8 = vld [vmem:[%s4410_s13 + $0x128] sm:$0xff]   ;;  %v4198_v9 = vld [vmem:[%s4410_s13 + $0x318] sm:$0xff]  }
  0x30   : > { %v4179_v10 = vld [vmem:[%s4410_s13 + $0x130] sm:$0xff]   ;;  %v4201_v11 = vld [vmem:[%s4410_s13 + $0x320] sm:$0xff]  }
  0x31   : > { %v4183_v14 = vld [vmem:[%s4410_s13 + $0x140] sm:$0xff]   ;;  %v4205_v15 = vld [vmem:[%s4410_s13 + $0x330] sm:$0xff]  }
  0x32   : > { %3807 = vmatmul.mubr.msk.bf16.gmra.mrb[12].mxu0 %vm1145_vm0, %v4124_v12  ;;  %v4180_v12 = vld [vmem:[%s4410_s13 + $0x138] sm:$0xff]   ;;  %v4187_v18 = vld [vmem:[%s4410_s13 + $0x150] sm:$0xff]   ;;  %v4209_v19 = vld [vmem:[%s4410_s13 + $0x340] sm:$0xff]  }
  0x33   : > { %3810 = vmatprep.mubr.msk.bf16.mxu0 %vm1145_vm0, %v4125_v13  ;;  %v4202_v13 = vld [vmem:[%s4410_s13 + $0x328] sm:$0xff]  }
  0x35   : > { %3939 = vmatmul.mubr.msk.bf16.gmra.mrb[12].mxu1 %vm1145_vm0, %v4146_v22  ;;  %v4191_v22 = vld [vmem:[%s4410_s13 + $0x160] sm:$0xff]  }
  0x36   : > { %3942 = vmatprep.mubr.msk.bf16.mxu1 %vm1145_vm0, %v4149_v23  ;;  %v4213_v23 = vld [vmem:[%s4410_s13 + $0x350] sm:$0xff]  }
  0x3a   : > { %3811 = vmatmul.mubr.msk.bf16.gmra.mrb[16].mxu0 %vm1145_vm0, %v4126_v16  ;;  %v4184_v16 = vld [vmem:[%s4410_s13 + $0x148] sm:$0xff]  }
  0x3b   : > { %3814 = vmatprep.mubr.msk.bf16.mxu0 %vm1145_vm0, %v4127_v17  ;;  %v4206_v17 = vld [vmem:[%s4410_s13 + $0x338] sm:$0xff]  }
  0x3d   : > { %3943 = vmatmul.mubr.msk.bf16.gmra.mrb[16].mxu1 %vm1145_vm0, %v4150_v26  ;;  %v4195_v26 = vld [vmem:[%s4410_s13 + $0x170] sm:$0xff]  }
  0x3e   : > { %3946 = vmatprep.mubr.msk.bf16.mxu1 %vm1145_vm0, %v4153_v27  ;;  %v4217_v27 = vld [vmem:[%s4410_s13 + $0x360] sm:$0xff]  }
  0x42   : > { %3815 = vmatmul.mubr.msk.bf16.gmra.mrb[20].mxu0 %vm1145_vm0, %v4128_v20  ;;  %v4188_v20 = vld [vmem:[%s4410_s13 + $0x158] sm:$0xff]  }
  0x43   : > { %3818 = vmatprep.mubr.msk.bf16.mxu0 %vm1145_vm0, %v4129_v21  ;;  %v4210_v21 = vld [vmem:[%s4410_s13 + $0x348] sm:$0xff]  }
  0x45   : > { %3947 = vmatmul.mubr.msk.bf16.gmra.mrb[20].mxu1 %vm1145_vm0, %v4154_v30  ;;  %v4199_v30 = vld [vmem:[%s4410_s13 + $0x180] sm:$0xff]  }
  0x46   : > { %3950 = vmatprep.mubr.msk.bf16.mxu1 %vm1145_vm0, %v4157_v31  ;;  %v4221_v31 = vld [vmem:[%s4410_s13 + $0x370] sm:$0xff]  }
  0x4a   : > { %3819 = vmatmul.mubr.msk.bf16.gmra.mrb[24].mxu0 %vm1145_vm0, %v4130_v24  ;;  %v4192_v24 = vld [vmem:[%s4410_s13 + $0x168] sm:$0xff]  }
  0x4b   : > { %3822 = vmatprep.mubr.msk.bf16.mxu0 %vm1145_vm0, %v4131_v25  ;;  %v4214_v25 = vld [vmem:[%s4410_s13 + $0x358] sm:$0xff]  }
  0x4d   : > { %3951 = vmatmul.mubr.msk.bf16.gmra.mrb[24].mxu1 %vm1145_vm0, %v4158_v34  ;;  %v4203_v34 = vld [vmem:[%s4410_s13 + $0x190] sm:$0xff]  }
  0x4e   : > { %3954 = vmatprep.mubr.msk.bf16.mxu1 %vm1145_vm0, %v4161_v35  ;;  %v4225_v35 = vld [vmem:[%s4410_s13 + $0x380] sm:$0xff]  }
  0x52   : > { %3823 = vmatmul.mubr.msk.bf16.gmra.mrb[28].mxu0 %vm1145_vm0, %v4132_v28  ;;  %v4196_v28 = vld [vmem:[%s4410_s13 + $0x178] sm:$0xff]  }
  0x53   : > { %3826 = vmatprep.mubr.msk.bf16.mxu0 %vm1145_vm0, %v4135_v29  ;;  %v4218_v29 = vld [vmem:[%s4410_s13 + $0x368] sm:$0xff]  }
  0x55   : > { %3955 = vmatmul.mubr.msk.bf16.gmra.mrb[28].mxu1 %vm1145_vm0, %v4162_v38  ;;  %v4204_v38 = vld [vmem:[%s4410_s13 + $0x198] sm:$0xff]  }
  0x56   : > { %3958 = vmatprep.mubr.msk.bf16.mxu1 %vm1145_vm0, %v4165_v39  ;;  %v4226_v39 = vld [vmem:[%s4410_s13 + $0x388] sm:$0xff]  }
  0x5a   : > { %3827 = vmatmul.mubr.msk.bf16.gmra.mrb[32].mxu0 %vm1145_vm0, %v4136_v32  ;;  %v4200_v32 = vld [vmem:[%s4410_s13 + $0x188] sm:$0xff]  }
  0x5b   : > { %3830 = vmatprep.mubr.msk.bf16.mxu0 %vm1145_vm0, %v4139_v33  ;;  %v4222_v33 = vld [vmem:[%s4410_s13 + $0x378] sm:$0xff]  }
  0x5d   : > { %3959 = vmatmul.mubr.msk.bf16.gmra.mrb[32].mxu1 %vm1145_vm0, %v4166_v42  ;;  %v4208_v42 = vld [vmem:[%s4410_s13 + $0x1a8] sm:$0xff]  }
  0x5e   : > { %3962 = vmatprep.mubr.msk.bf16.mxu1 %vm1145_vm0, %v4169_v43  ;;  %v4230_v43 = vld [vmem:[%s4410_s13 + $0x398] sm:$0xff]  }
  0x62   : > { %3831 = vmatmul.mubr.msk.bf16.gmra.mrb[36].mxu0 %vm1145_vm0, %v4140_v36  ;;  %v4245_v36 = vld [vmem:[%s5135_s3] sm:$0xff]  }
  0x63   : > { %3834 = vmatprep.mubr.msk.bf16.mxu0 %vm1145_vm0, %v4143_v37  ;;  %v4319_v37 = vmov 0.0  }
  0x64   : > { %4050 = vmatprep.subr.bf16.mxu1 %v4319_v37 }
  0x65   : > { %3963 = vmatmul.mubr.msk.bf16.gmra.mrb[36].mxu1 %vm1145_vm0, %v4170_v46  ;;  %v4632_v46 = vld [vmem:[%s5134_s2] ss:$0 sm:$0xff] }
  0x66   : > { %3966 = vmatprep.mubr.msk.bf16.mxu1 %vm1145_vm0, %v4173_v47  ;;  %4051 = vmatpush3.bf16.msra.mxu1 %v4245_v36 }
  0x67   : > { %4052 = vmatprep.subr.bf16.mxu1 %v4319_v37 }
  0x6a   : > { %3835 = vmatmul.mubr.msk.bf16.gmra.mrb[40].mxu0 %vm1145_vm0, %v4144_v40  ;;  %v4207_v40 = vld [vmem:[%s4410_s13 + $0x1a0] sm:$0xff]  }
  0x6b   : > { %3838 = vmatprep.mubr.msk.bf16.mxu0 %vm1145_vm0, %v4147_v41  ;;  %v4229_v41 = vld [vmem:[%s4410_s13 + $0x390] sm:$0xff]  }
  0x6d   : > { %3967 = vmatmul.mubr.msk.bf16.gmra.mrb[40].mxu1 %vm1145_vm0, %v4174_v50  ;;  %v4234_v50 = vld [vmem:[%s4410_s13 + $0x3a8] sm:$0xff]  }
  0x6e   : > { %3970 = vmatprep.mubr.msk.bf16.mxu1 %vm1145_vm0, %v4177_v51 }
  0x72   : > { %3839 = vmatmul.mubr.msk.bf16.gmra.mrb[44].mxu0 %vm1145_vm0, %v4148_v44  ;;  %v4211_v44 = vld [vmem:[%s4410_s13 + $0x1b0] sm:$0xff]  }
  0x73   : > { %3842 = vmatprep.mubr.msk.bf16.mxu0 %vm1145_vm0, %v4151_v45  ;;  %v4233_v45 = vld [vmem:[%s4410_s13 + $0x3a0] sm:$0xff]  }
  0x75   : > { %3971 = vmatmul.mubr.msk.bf16.gmra.mrb[44].mxu1 %vm1145_vm0, %v4178_v54  ;;  %v4235_v54 = vld [vmem:[%s4410_s13 + $0x3b0] sm:$0xff]  }
  0x76   : > { %3974 = vmatprep.mubr.msk.bf16.mxu1 %vm1145_vm0, %v4181_v55 }
  0x7a   : > { %3843 = vmatmul.mubr.msk.bf16.gmra.mrb[48].mxu0 %vm1145_vm0, %v4152_v48 }
  0x7b   : > { %3846 = vmatprep.mubr.msk.bf16.mxu0 %vm1145_vm0, %v4155_v49  ;;  %v4212_v49 = vld [vmem:[%s4410_s13 + $0x1b8] sm:$0xff]  }
  0x7d   : > { %3975 = vmatmul.mubr.msk.bf16.gmra.mrb[48].mxu1 %vm1145_vm0, %v4182_v58 }
  0x7e   : > { %3978 = vmatprep.mubr.msk.bf16.mxu1 %vm1145_vm0, %v4185_v59 }
  0x82   : > { %3847 = vmatmul.mubr.msk.bf16.gmra.mrb[52].mxu0 %vm1145_vm0, %v4156_v52 }
  0x83   : > { %3850 = vmatprep.mubr.msk.bf16.mxu0 %vm1145_vm0, %v4159_v53  ;;  %v4215_v53 = vld [vmem:[%s4410_s13 + $0x1c0] sm:$0xff]  }
  0x85   : > { %3979 = vmatmul.mubr.msk.bf16.gmra.mrb[52].mxu1 %vm1145_vm0, %v4186_v62 }
  0x86   : > { %3982 = vmatprep.mubr.msk.bf16.mxu1 %vm1145_vm0, %v4189_v63 }
  0x8a   : > { %3851 = vmatmul.mubr.msk.bf16.gmra.mrb[56].mxu0 %vm1145_vm0, %v4160_v56 }
  0x8b   : > { %3854 = vmatprep.mubr.msk.bf16.mxu0 %vm1145_vm0, %v4163_v57 }
  0x8d   : > { %3983 = vmatmul.mubr.msk.bf16.gmra.mrb[56].mxu1 %vm1145_vm0, %v4190_v1  ;;  %v4216_v1 = vld [vmem:[%s4410_s13 + $0x1c8] sm:$0xff]  }
  0x8e   : > { %3986 = vmatprep.mubr.msk.bf16.mxu1 %vm1145_vm0, %v4193_v3 }
  0x92   : > { %3855 = vmatmul.mubr.msk.bf16.gmra.mrb[60].mxu0 %vm1145_vm0, %v4164_v60 }
  0x93   : > { %3858 = vmatprep.mubr.msk.bf16.mxu0 %vm1145_vm0, %v4167_v61 }
  0x95   : > { %3987 = vmatmul.mubr.msk.bf16.gmra.mrb[60].mxu1 %vm1145_vm0, %v4194_v5 }
  0x96   : > { %3990 = vmatprep.mubr.msk.bf16.mxu1 %vm1145_vm0, %v4197_v7  ;;  %v4219_v7 = vld [vmem:[%s4410_s13 + $0x1d0] sm:$0xff]  }
  0x9a   : > { %3859 = vmatmul.mubr.msk.bf16.gmra.mrb[64].mxu0 %vm1145_vm0, %v4168_v0 }
  0x9b   : > { %3862 = vmatprep.mubr.msk.bf16.mxu0 %vm1145_vm0, %v4171_v2  ;;  %v4236_v2 = vld [vmem:[%s4410_s13 + $0x3b8] sm:$0xff]  }
  0x9d   : > { %3991 = vmatmul.mubr.msk.bf16.gmra.mrb[64].mxu1 %vm1145_vm0, %v4198_v9 }
  0x9e   : > { %3994 = vmatprep.mubr.msk.bf16.mxu1 %vm1145_vm0, %v4201_v11 }
  0xa2   : > { %3863 = vmatmul.mubr.msk.bf16.gmra.mrb[68].mxu0 %vm1145_vm0, %v4172_v4 }
  0xa3   : > { %3866 = vmatprep.mubr.msk.bf16.mxu0 %vm1145_vm0, %v4175_v6 }
  0xa5   : > { %3995 = vmatmul.mubr.msk.bf16.gmra.mrb[68].mxu1 %vm1145_vm0, %v4202_v13 }
  0xa6   : > { %3998 = vmatprep.mubr.msk.bf16.mxu1 %vm1145_vm0, %v4205_v15 }
  0xaa   : > { %3867 = vmatmul.mubr.msk.bf16.gmra.mrb[72].mxu0 %vm1145_vm0, %v4176_v8  ;;  %v4237_v8 = vld [vmem:[%s4410_s13 + $0x3c0] sm:$0xff]  }
  0xab   : > { %3870 = vmatprep.mubr.msk.bf16.mxu0 %vm1145_vm0, %v4179_v10 }
  0xad   : > { %3999 = vmatmul.mubr.msk.bf16.gmra.mrb[72].mxu1 %vm1145_vm0, %v4206_v17 }
  0xae   : > { %4002 = vmatprep.mubr.msk.bf16.mxu1 %vm1145_vm0, %v4209_v19 }
  0xb2   : > { %3871 = vmatmul.mubr.msk.bf16.gmra.mrb[76].mxu0 %vm1145_vm0, %v4180_v12 }
  0xb3   : > { %3874 = vmatprep.mubr.msk.bf16.mxu0 %vm1145_vm0, %v4183_v14 }
  0xb5   : > { %4003 = vmatmul.mubr.msk.bf16.gmra.mrb[76].mxu1 %vm1145_vm0, %v4210_v21 }
  0xb6   : > { %4006 = vmatprep.mubr.msk.bf16.mxu1 %vm1145_vm0, %v4213_v23  ;;  %v4238_v23 = vld [vmem:[%s4410_s13 + $0x3c8] sm:$0xff]  }
  0xba   : > { %3875 = vmatmul.mubr.msk.bf16.gmra.mrb[80].mxu0 %vm1145_vm0, %v4184_v16 }
  0xbb   : > { %3878 = vmatprep.mubr.msk.bf16.mxu0 %vm1145_vm0, %v4187_v18 }
  0xbd   : > { %4007 = vmatmul.mubr.msk.bf16.gmra.mrb[80].mxu1 %vm1145_vm0, %v4214_v25 }
  0xbe   : > { %4010 = vmatprep.mubr.msk.bf16.mxu1 %vm1145_vm0, %v4217_v27 }
  0xc2   : > { %3879 = vmatmul.mubr.msk.bf16.gmra.mrb[84].mxu0 %vm1145_vm0, %v4188_v20 }
  0xc3   : > { %3882 = vmatprep.mubr.msk.bf16.mxu0 %vm1145_vm0, %v4191_v22  ;;  %v4220_v22 = vld [vmem:[%s4410_s13 + $0x1d8] sm:$0xff]  }
  0xc5   : > { %4011 = vmatmul.mubr.msk.bf16.gmra.mrb[84].mxu1 %vm1145_vm0, %v4218_v29  ;;  %v4223_v29 = vld [vmem:[%s4410_s13 + $0x1e0] sm:$0xff]  }
  0xc6   : > { %4014 = vmatprep.mubr.msk.bf16.mxu1 %vm1145_vm0, %v4221_v31  ;;  %v4239_v31 = vld [vmem:[%s4410_s13 + $0x3d0] sm:$0xff]  }
  0xca   : > { %3883 = vmatmul.mubr.msk.bf16.gmra.mrb[88].mxu0 %vm1145_vm0, %v4192_v24 }
  0xcb   : > { %3886 = vmatprep.mubr.msk.bf16.mxu0 %vm1145_vm0, %v4195_v26 }
  0xcd   : > { %4015 = vmatmul.mubr.msk.bf16.gmra.mrb[88].mxu1 %vm1145_vm0, %v4222_v33 }
  0xce   : > { %4018 = vmatprep.mubr.msk.bf16.mxu1 %vm1145_vm0, %v4225_v35 }
  0xd2   : > { %3887 = vmatmul.mubr.msk.bf16.gmra.mrb[92].mxu0 %vm1145_vm0, %v4196_v28 }
  0xd3   : > { %3890 = vmatprep.mubr.msk.bf16.mxu0 %vm1145_vm0, %v4199_v30 }
  0xd5   : > { %4019 = vmatmul.mubr.msk.bf16.gmra.mrb[92].mxu1 %vm1145_vm0, %v4226_v39 }
  0xd6   : > { %4022 = vmatprep.mubr.msk.bf16.mxu1 %vm1145_vm0, %v4229_v41 }
  0xda   : > { %3891 = vmatmul.mubr.msk.bf16.gmra.mrb[96].mxu0 %vm1145_vm0, %v4200_v32 }
  0xdb   : > { %3894 = vmatprep.mubr.msk.bf16.mxu0 %vm1145_vm0, %v4203_v34 }
  0xdd   : > { %4023 = vmatmul.mubr.msk.bf16.gmra.mrb[96].mxu1 %vm1145_vm0, %v4230_v43 }
  0xde   : > { %4026 = vmatprep.mubr.msk.bf16.mxu1 %vm1145_vm0, %v4233_v45 }
  0xe2   : > { %3895 = vmatmul.mubr.msk.bf16.gmra.mrb[100].mxu0 %vm1145_vm0, %v4204_v38 }
  0xe3   : > { %3898 = vmatprep.mubr.msk.bf16.mxu0 %vm1145_vm0, %v4207_v40 }
  0xe5   : > { %4027 = vmatmul.mubr.msk.bf16.gmra.mrb[100].mxu1 %vm1145_vm0, %v4234_v50  ;;  %v4240_v50 = vld [vmem:[%s4410_s13 + $0x3d8] sm:$0xff]  }
  0xe6   : > { %4030 = vmatprep.mubr.msk.bf16.mxu1 %vm1145_vm0, %v4235_v54 }
  0xea   : > { %3899 = vmatmul.mubr.msk.bf16.gmra.mrb[104].mxu0 %vm1145_vm0, %v4208_v42 }
  0xeb   : > { %3902 = vmatprep.mubr.msk.bf16.mxu0 %vm1145_vm0, %v4211_v44 }
  0xed   : > { %v3796_v47 = vpop.f32.mrb[0].mxu0  ;;  %4031 = vmatmul.mubr.msk.bf16.gmra.mrb[104].mxu1 %vm1145_vm0, %v4236_v2 }
  0xee   : > { %v1564_v48 = vpop.f32.mrb[1].mxu0  ;;  %v1573_v56 = vadd.f32 %v3796_v47, %v4632_v46  ;;  %4034 = vmatprep.mubr.msk.bf16.mxu1 %vm1145_vm0, %v4237_v8  ;;  %v4246_v47 = vld [vmem:[%s5135_s3 + $0x8] sm:$0xff]  }
  0xef   : > { %v1565_v51 = vadd.f32 %v4632_v46, %v1564_v48  ;;  %v3797_v52 = vpop.f32.mrb[2].mxu0  ;;  %4053 = vmatpush3.bf16.msra.mxu1 %v4246_v47 }
  0xf0   : > { %v1567_v55 = vpop.f32.mrb[3].mxu0  ;;  %v1576_v59 = vadd.f32 %v3797_v52, %v4632_v46  ;;  %v2589_v61 = vmax.f32 %v1573_v56, 0.0  ;;  %v4658_v20 = vpop.f32.mrb[0].mxu1  ;;  %v4227_v56 = vld [vmem:[%s4410_s13 + $0x1f0] sm:$0xff]   ;;  %4054 = vmatprep.subr.bf16.mxu1 %v4319_v37 }
  0xf1   : > { %v1568_v57 = vadd.f32 %v4632_v46, %v1567_v55  ;;  %v2587_v58 = vmax.f32 %v1565_v51, 0.0  ;;  %v4662_v24 = vpop.f32.mrb[1].mxu1 }
  0xf2   : > { %3903 = vmatmul.mubr.msk.bf16.gmra.mrb[108].mxu0 %vm1145_vm0, %v4212_v49  ;;  %v2590_v3 = vmax.f32 %v1576_v59, 0.0  ;;  %v4666_v30 = vpop.f32.mrb[2].mxu1  ;;  %v4224_v49 = vld [vmem:[%s4410_s13 + $0x1e8] sm:$0xff]  }
  0xf3   : > { %v2588_v60 = vmax.f32 %v1568_v57, 0.0  ;;  %3906 = vmatprep.mubr.msk.bf16.mxu0 %vm1145_vm0, %v4215_v53  ;;  %v4669_v33 = vpop.f32.mrb[3].mxu1 }
  0xf5   : > { %v2843_v62 = vadd.f32 %v2588_v60, %v2587_v58  ;;  %v3800_v63 = vpop.f32.mrb[4].mxu0  ;;  %4035 = vmatmul.mubr.msk.bf16.gmra.mrb[108].mxu1 %vm1145_vm0, %v4238_v23  ;;  %v4241_v58 = vld [vmem:[%s4410_s13 + $0x3e0] sm:$0xff]  }
  0xf6   : > { %v1580_v0 = vpop.f32.mrb[5].mxu0  ;;  %v1589_v10 = vadd.f32 %v3800_v63, %v4632_v46  ;;  %4038 = vmatprep.mubr.msk.bf16.mxu1 %vm1145_vm0, %v4239_v31 }
  0xf7   : > { %v2844_v4 = vadd.f32 %v2843_v62, %v2589_v61  ;;  %v1581_v5 = vadd.f32 %v4632_v46, %v1580_v0  ;;  %v3801_v6 = vpop.f32.mrb[6].mxu0 }
  0xf8   : > { %v1583_v9 = vpop.f32.mrb[7].mxu0  ;;  %v1592_v15 = vadd.f32 %v3801_v6, %v4632_v46  ;;  %v2593_v17 = vmax.f32 %v1589_v10, 0.0  ;;  %v4678_v45 = vpop.f32.mrb[4].mxu1  ;;  %v4242_v10 = vld [vmem:[%s4410_s13 + $0x3e8] sm:$0xff]  }
  0xf9   : > { %v2591_v11 = vmax.f32 %v1581_v5, 0.0  ;;  %v2845_v12 = vadd.f32 %v2844_v4, %v2590_v3  ;;  %v1584_v13 = vadd.f32 %v4632_v46, %v1583_v9  ;;  %v4685_v51 = vpop.f32.mrb[5].mxu1  ;;  %v4228_v9 = vld [vmem:[%s4410_s13 + $0x1f8] sm:$0xff]  }
  0xfa   : > { %3907 = vmatmul.mubr.msk.bf16.gmra.mrb[112].mxu0 %vm1145_vm0, %v4216_v1  ;;  %v2594_v25 = vmax.f32 %v1592_v15, 0.0  ;;  %v4689_v57 = vpop.f32.mrb[6].mxu1 }
  0xfb   : > { %v2846_v14 = vadd.f32 %v2845_v12, %v2591_v11  ;;  %v2592_v16 = vmax.f32 %v1584_v13, 0.0  ;;  %3910 = vmatprep.mubr.msk.bf16.mxu0 %vm1145_vm0, %v4219_v7  ;;  %v4692_v60 = vpop.f32.mrb[7].mxu1 }
  0xfd   : > { %v2847_v18 = vadd.f32 %v2846_v14, %v2592_v16  ;;  %v3804_v19 = vpop.f32.mrb[8].mxu0  ;;  %4039 = vmatmul.mubr.msk.bf16.gmra.mrb[112].mxu1 %vm1145_vm0, %v4240_v50  ;;  %v4231_v16 = vld [vmem:[%s4410_s13 + $0x200] sm:$0xff]  }
  0xfe   : > { %v1596_v21 = vpop.f32.mrb[9].mxu0  ;;  %v1605_v34 = vadd.f32 %v3804_v19, %v4632_v46  ;;  %4042 = vmatprep.mubr.msk.bf16.mxu1 %vm1145_vm0, %v4241_v58 }
  0xff   : > { %v2848_v26 = vadd.f32 %v2847_v18, %v2593_v17  ;;  %v1597_v27 = vadd.f32 %v4632_v46, %v1596_v21  ;;  %v3805_v28 = vpop.f32.mrb[10].mxu0  ;;  %v4243_v18 = vld [vmem:[%s4410_s13 + $0x3f0] sm:$0xff]  }
 0x100   : > { %v1599_v32 = vpop.f32.mrb[11].mxu0  ;;  %v1608_v40 = vadd.f32 %v3805_v28, %v4632_v46  ;;  %v2597_v42 = vmax.f32 %v1605_v34, 0.0  ;;  %v4702_v7 = vpop.f32.mrb[8].mxu1 }
 0x101   : > { %v2595_v35 = vmax.f32 %v1597_v27, 0.0  ;;  %v2849_v36 = vadd.f32 %v2848_v26, %v2594_v25  ;;  %v1600_v38 = vadd.f32 %v4632_v46, %v1599_v32  ;;  %v4706_v11 = vpop.f32.mrb[9].mxu1 }
 0x102   : > { %3911 = vmatmul.mubr.msk.bf16.gmra.mrb[116].mxu0 %vm1145_vm0, %v4220_v22  ;;  %v2598_v52 = vmax.f32 %v1608_v40, 0.0  ;;  %v4710_v17 = vpop.f32.mrb[10].mxu1 }
 0x103   : > { %v2850_v39 = vadd.f32 %v2849_v36, %v2595_v35  ;;  %v2596_v41 = vmax.f32 %v1600_v38, 0.0  ;;  %3914 = vmatprep.mubr.msk.bf16.mxu0 %vm1145_vm0, %v4223_v29  ;;  %v4713_v21 = vpop.f32.mrb[11].mxu1  ;;  %v4232_v38 = vld [vmem:[%s4410_s13 + $0x208] sm:$0xff]  }
 0x105   : > { %v2851_v43 = vadd.f32 %v2850_v39, %v2596_v41  ;;  %v3808_v44 = vpop.f32.mrb[12].mxu0  ;;  %4043 = vmatmul.mubr.msk.bf16.gmra.mrb[116].mxu1 %vm1145_vm0, %v4242_v10  ;;  %v4244_v39 = vld [vmem:[%s4410_s13 + $0x3f8] sm:$0xff]   ;;  %s5090_s13 = scalar_lea.hbm %s5137_s5, %s3648_s8 }
 0x106   : > { %v1612_v48 = vpop.f32.mrb[13].mxu0  ;;  %v1621_v61 = vadd.f32 %v3808_v44, %v4632_v46  ;;  %4046 = vmatprep.mubr.msk.bf16.mxu1 %vm1145_vm0, %v4243_v18 }
 0x107   : > { %v2852_v53 = vadd.f32 %v2851_v43, %v2597_v42  ;;  %v1613_v54 = vadd.f32 %v4632_v46, %v1612_v48  ;;  %v3809_v55 = vpop.f32.mrb[14].mxu0  ;;  %v4247_v48 = vld [vmem:[%s5135_s3 + $0x10] sm:$0xff]  }
 0x108   : > { %v1615_v59 = vpop.f32.mrb[15].mxu0  ;;  %v1624_v2 = vadd.f32 %v3809_v55, %v4632_v46  ;;  %v2601_v4 = vmax.f32 %v1621_v61, 0.0  ;;  %v4722_v35 = vpop.f32.mrb[12].mxu1  ;;  %4055 = vmatpush3.bf16.msra.mxu1 %v4247_v48 }
 0x109   : > { %v2599_v62 = vmax.f32 %v1613_v54, 0.0  ;;  %v2853_v63 = vadd.f32 %v2852_v53, %v2598_v52  ;;  %v1616_v0 = vadd.f32 %v4632_v46, %v1615_v59  ;;  %v4726_v40 = vpop.f32.mrb[13].mxu1  ;;  %4056 = vmatprep.subr.bf16.mxu1 %v4319_v37 }
 0x10a   : > { %3915 = vmatmul.mubr.msk.bf16.gmra.mrb[120].mxu0 %vm1145_vm0, %v4224_v49  ;;  %v2602_v12 = vmax.f32 %v1624_v2, 0.0  ;;  %v4729_v47 = vpop.f32.mrb[14].mxu1 }
 0x10b   : > { %v2854_v1 = vadd.f32 %v2853_v63, %v2599_v62  ;;  %v2600_v3 = vmax.f32 %v1616_v0, 0.0  ;;  %3918 = vmatprep.mubr.msk.bf16.mxu0 %vm1145_vm0, %v4227_v56  ;;  %v4734_v50 = vpop.f32.mrb[15].mxu1 }
 0x10d   : > { %v2855_v5 = vadd.f32 %v2854_v1, %v2600_v3  ;;  %v3812_v6 = vpop.f32.mrb[16].mxu0  ;;  %4047 = vmatmul.mubr.msk.bf16.gmra.mrb[120].mxu1 %vm1145_vm0, %v4244_v39 }
 0x10e   : > { %v1628_v8 = vpop.f32.mrb[17].mxu0  ;;  %v1637_v22 = vadd.f32 %v3812_v6, %v4632_v46  ;;  %4066 = vmatprep.mubr.msk.bf16.mxu1 %vm4320_vm2, %v4319_v37 }
 0x10f   : > { %v2856_v13 = vadd.f32 %v2855_v5, %v2601_v4  ;;  %v1629_v14 = vadd.f32 %v4632_v46, %v1628_v8  ;;  %v3813_v15 = vpop.f32.mrb[18].mxu0 }
 0x110   : > { %v1631_v19 = vpop.f32.mrb[19].mxu0  ;;  %v1640_v28 = vadd.f32 %v3813_v15, %v4632_v46  ;;  %v2605_v31 = vmax.f32 %v1637_v22, 0.0  ;;  %v4742_v0 = vpop.f32.mrb[16].mxu1 }
 0x111   : > { %v2603_v23 = vmax.f32 %v1629_v14, 0.0  ;;  %v2857_v25 = vadd.f32 %v2856_v13, %v2602_v12  ;;  %v1632_v26 = vadd.f32 %v4632_v46, %v1631_v19  ;;  %v4744_v2 = vpop.f32.mrb[17].mxu1 }
 0x112   : > { %3919 = vmatmul.mubr.msk.bf16.gmra.mrb[124].mxu0 %vm1145_vm0, %v4228_v9  ;;  %v2606_v41 = vmax.f32 %v1640_v28, 0.0  ;;  %v4747_v8 = vpop.f32.mrb[18].mxu1 }
 0x113   : > { %v2858_v27 = vadd.f32 %v2857_v25, %v2603_v23  ;;  %v2604_v29 = vmax.f32 %v1632_v26, 0.0  ;;  %3922 = vmatprep.mubr.msk.bf16.mxu0 %vm1145_vm0, %v4231_v16  ;;  %v4749_v10 = vpop.f32.mrb[19].mxu1 }
 0x115   : > { %v2859_v32 = vadd.f32 %v2858_v27, %v2604_v29  ;;  %v3816_v34 = vpop.f32.mrb[20].mxu0 }
 0x116   : > { %v1644_v36 = vpop.f32.mrb[21].mxu0  ;;  %v1653_v52 = vadd.f32 %v3816_v34, %v4632_v46 }
 0x117   : > { %v2860_v42 = vadd.f32 %v2859_v32, %v2605_v31  ;;  %v1645_v43 = vadd.f32 %v4632_v46, %v1644_v36  ;;  %v3817_v44 = vpop.f32.mrb[22].mxu0 }
 0x118   : > { %v1647_v49 = vpop.f32.mrb[23].mxu0  ;;  %v1656_v58 = vadd.f32 %v3817_v44, %v4632_v46  ;;  %v2609_v61 = vmax.f32 %v1653_v52, 0.0  ;;  %v4754_v26 = vpop.f32.mrb[20].mxu1 }
 0x119   : > { %v2607_v53 = vmax.f32 %v1645_v43, 0.0  ;;  %v2861_v54 = vadd.f32 %v2860_v42, %v2606_v41  ;;  %v1648_v55 = vadd.f32 %v4632_v46, %v1647_v49  ;;  %v4756_v28 = vpop.f32.mrb[21].mxu1 }
 0x11a   : > { %3923 = vmatmul.mubr.msk.bf16.gmra.mrb[128].mxu0 %vm1145_vm0, %v4232_v38  ;;  %v2610_v3 = vmax.f32 %v1656_v58, 0.0  ;;  %v4759_v36 = vpop.f32.mrb[22].mxu1 }
 0x11b   : > { %v2862_v56 = vadd.f32 %v2861_v54, %v2607_v53  ;;  %v2608_v59 = vmax.f32 %v1648_v55, 0.0  ;;  %v4761_v39 = vpop.f32.mrb[23].mxu1 }
 0x11d   : > { %v2863_v62 = vadd.f32 %v2862_v56, %v2608_v59  ;;  %v3820_v63 = vpop.f32.mrb[24].mxu0 }
 0x11e   : > { %v1660_v1 = vpop.f32.mrb[25].mxu0  ;;  %v1669_v12 = vadd.f32 %v3820_v63, %v4632_v46 }
 0x11f   : > { %v2864_v4 = vadd.f32 %v2863_v62, %v2609_v61  ;;  %v1661_v5 = vadd.f32 %v4632_v46, %v1660_v1  ;;  %v3821_v6 = vpop.f32.mrb[26].mxu0 }
 0x120   : > { %v1663_v9 = vpop.f32.mrb[27].mxu0  ;;  %v1672_v18 = vadd.f32 %v3821_v6, %v4632_v46  ;;  %v2613_v22 = vmax.f32 %v1669_v12, 0.0  ;;  %v4766_v56 = vpop.f32.mrb[24].mxu1 }
 0x121   : > { %v2611_v13 = vmax.f32 %v1661_v5, 0.0  ;;  %v2865_v14 = vadd.f32 %v2864_v4, %v2610_v3  ;;  %v1664_v15 = vadd.f32 %v4632_v46, %v1663_v9  ;;  %v4768_v59 = vpop.f32.mrb[25].mxu1 }
 0x122   : > { %v2614_v29 = vmax.f32 %v1672_v18, 0.0  ;;  %v4771_v3 = vpop.f32.mrb[26].mxu1 }
 0x123   : > { %v2866_v16 = vadd.f32 %v2865_v14, %v2611_v13  ;;  %v2612_v19 = vmax.f32 %v1664_v15, 0.0  ;;  %v4773_v5 = vpop.f32.mrb[27].mxu1 }
 0x125   : > { %v2867_v23 = vadd.f32 %v2866_v16, %v2612_v19  ;;  %v3824_v25 = vpop.f32.mrb[28].mxu0 }
 0x126   : > { %v1676_v27 = vpop.f32.mrb[29].mxu0  ;;  %v1685_v41 = vadd.f32 %v3824_v25, %v4632_v46 }
 0x127   : > { %v2868_v31 = vadd.f32 %v2867_v23, %v2613_v22  ;;  %v1677_v32 = vadd.f32 %v4632_v46, %v1676_v27  ;;  %v3825_v34 = vpop.f32.mrb[30].mxu0 }
 0x128   : > { %v1679_v38 = vpop.f32.mrb[31].mxu0  ;;  %v1688_v49 = vadd.f32 %v3825_v34, %v4632_v46  ;;  %v2617_v53 = vmax.f32 %v1685_v41, 0.0  ;;  %v3956_v22 = vpop.f32.mrb[28].mxu1 }
 0x129   : > { %v2615_v42 = vmax.f32 %v1677_v32, 0.0  ;;  %v2869_v43 = vadd.f32 %v2868_v31, %v2614_v29  ;;  %v1680_v44 = vadd.f32 %v4632_v46, %v1679_v38  ;;  %v2204_v25 = vpop.f32.mrb[29].mxu1 }
 0x12a   : > { %v2618_v61 = vmax.f32 %v1688_v49, 0.0  ;;  %v2205_v34 = vadd.f32 %v4632_v46, %v2204_v25  ;;  %v3957_v38 = vpop.f32.mrb[30].mxu1 }
 0x12b   : > { %v2870_v48 = vadd.f32 %v2869_v43, %v2615_v42  ;;  %v2616_v52 = vmax.f32 %v1680_v44, 0.0  ;;  %v2213_v42 = vadd.f32 %v3956_v22, %v4632_v46  ;;  %v2207_v43 = vpop.f32.mrb[31].mxu1 }
 0x12d   : > { %v2871_v54 = vadd.f32 %v2870_v48, %v2616_v52  ;;  %v3828_v55 = vpop.f32.mrb[32].mxu0 }
 0x12e   : > { %v1692_v58 = vpop.f32.mrb[33].mxu0  ;;  %v1701_v9 = vadd.f32 %v3828_v55, %v4632_v46  ;;  %v2208_v55 = vadd.f32 %v4632_v46, %v2207_v43 }
 0x12f   : > { %v2872_v62 = vadd.f32 %v2871_v54, %v2617_v53  ;;  %v1693_v63 = vadd.f32 %v4632_v46, %v1692_v58  ;;  %v3829_v1 = vpop.f32.mrb[34].mxu0  ;;  %v2747_v53 = vmax.f32 %v2205_v34, 0.0  ;;  %v2216_v54 = vadd.f32 %v3957_v38, %v4632_v46 }
 0x130   : > { %v1695_v4 = vpop.f32.mrb[35].mxu0  ;;  %v1704_v14 = vadd.f32 %v3829_v1, %v4632_v46  ;;  %v2621_v16 = vmax.f32 %v1701_v9, 0.0  ;;  %v2748_v1 = vmax.f32 %v2208_v55, 0.0 }
 0x131   : > { %v4775_v6 = vadd.f32 %v2872_v62, %v2618_v61  ;;  %v1696_v12 = vadd.f32 %v4632_v46, %v1695_v4  ;;  %v2619_v13 = vmax.f32 %v1693_v63, 0.0  ;;  %v2749_v63 = vmax.f32 %v2213_v42, 0.0 }
 0x132   : > { %v2622_v27 = vmax.f32 %v1704_v14, 0.0 }
 0x133   : > { %v2620_v15 = vmax.f32 %v1696_v12, 0.0 }
 0x135   : > { %v2880_v18 = vadd.f32 %v2620_v15, %v2619_v13  ;;  %v3832_v19 = vpop.f32.mrb[36].mxu0  ;;  %v3960_v13 = vpop.f32.mrb[32].mxu1  ;;  %v2750_v15 = vmax.f32 %v2216_v54, 0.0 }
 0x136   : > { %v1708_v23 = vpop.f32.mrb[37].mxu0  ;;  %v1717_v44 = vadd.f32 %v3832_v19, %v4632_v46 }
 0x137   : > { %v2881_v29 = vadd.f32 %v2880_v18, %v2621_v16  ;;  %v1709_v31 = vadd.f32 %v4632_v46, %v1708_v23  ;;  %v3833_v32 = vpop.f32.mrb[38].mxu0  ;;  %v3028_v16 = vadd.f32 %v2748_v1, %v2747_v53  ;;  %v2220_v18 = vpop.f32.mrb[33].mxu1 }
 0x138   : > { %v1711_v41 = vpop.f32.mrb[39].mxu0  ;;  %v1720_v61 = vadd.f32 %v3833_v32, %v4632_v46  ;;  %v2625_v4 = vmax.f32 %v1717_v44, 0.0  ;;  %v2229_v44 = vadd.f32 %v3960_v13, %v4632_v46  ;;  %v4248_v13 = vld [vmem:[%s5135_s3 + $0x18] sm:$0xff]  }
 0x139   : > { %v2623_v48 = vmax.f32 %v1709_v31, 0.0  ;;  %v2882_v49 = vadd.f32 %v2881_v29, %v2622_v27  ;;  %v1712_v52 = vadd.f32 %v4632_v46, %v1711_v41  ;;  %v2221_v27 = vadd.f32 %v4632_v46, %v2220_v18  ;;  %v3961_v29 = vpop.f32.mrb[34].mxu1  ;;  %4057 = vmatpush3.bf16.msra.mxu1 %v4248_v13 }
 0x13a   : > { %v2626_v19 = vmax.f32 %v1720_v61, 0.0  ;;  %v3029_v34 = vadd.f32 %v3028_v16, %v2749_v63  ;;  %v2223_v38 = vpop.f32.mrb[35].mxu1  ;;  %v2232_v53 = vadd.f32 %v3961_v29, %v4632_v46  ;;  %4058 = vmatprep.subr.bf16.mxu1 %v4319_v37 }
 0x13b   : > { %v2883_v58 = vadd.f32 %v2882_v49, %v2623_v48  ;;  %v2624_v62 = vmax.f32 %v1712_v52, 0.0  ;;  %v2751_v49 = vmax.f32 %v2221_v27, 0.0 }
 0x13c   : > { %v3030_v52 = vadd.f32 %v3029_v34, %v2750_v15  ;;  %v2754_v15 = vmax.f32 %v2232_v53, 0.0 }
 0x13d   : > { %v2884_v9 = vadd.f32 %v2883_v58, %v2624_v62  ;;  %v3836_v12 = vpop.f32.mrb[40].mxu0  ;;  %v2224_v58 = vadd.f32 %v4632_v46, %v2223_v38 }
 0x13e   : > { %v1724_v14 = vpop.f32.mrb[41].mxu0  ;;  %v1733_v31 = vadd.f32 %v3836_v12, %v4632_v46  ;;  %v3031_v61 = vadd.f32 %v3030_v52, %v2751_v49  ;;  %v3964_v12 = vpop.f32.mrb[36].mxu1 }
 0x13f   : > { %v2885_v22 = vadd.f32 %v2884_v9, %v2625_v4  ;;  %v1725_v23 = vadd.f32 %v4632_v46, %v1724_v14  ;;  %v3837_v25 = vpop.f32.mrb[42].mxu0  ;;  %v2753_v4 = vmax.f32 %v2229_v44, 0.0  ;;  %v2752_v9 = vmax.f32 %v2224_v58, 0.0  ;;  %v2236_v18 = vpop.f32.mrb[37].mxu1 }
 0x140   : > { %v1727_v32 = vpop.f32.mrb[43].mxu0  ;;  %v1736_v48 = vadd.f32 %v3837_v25, %v4632_v46  ;;  %v2629_v62 = vmax.f32 %v1733_v31, 0.0  ;;  %v2237_v27 = vadd.f32 %v4632_v46, %v2236_v18  ;;  %v3965_v29 = vpop.f32.mrb[38].mxu1  ;;  %v2245_v34 = vadd.f32 %v3964_v12, %v4632_v46 }
 0x141   : > { %v2627_v41 = vmax.f32 %v1725_v23, 0.0  ;;  %v2886_v42 = vadd.f32 %v2885_v22, %v2626_v19  ;;  %v1728_v43 = vadd.f32 %v4632_v46, %v1727_v32  ;;  %v3032_v25 = vadd.f32 %v3031_v61, %v2752_v9  ;;  %v2239_v38 = vpop.f32.mrb[39].mxu1 }
 0x142   : > { %v2630_v14 = vmax.f32 %v1736_v48, 0.0  ;;  %v2755_v49 = vmax.f32 %v2237_v27, 0.0  ;;  %v2248_v52 = vadd.f32 %v3965_v29, %v4632_v46  ;;  %v2240_v53 = vadd.f32 %v4632_v46, %v2239_v38  ;;  %v3968_v13 = vpop.f32.mrb[40].mxu1 }
 0x143   : > { %v2887_v54 = vadd.f32 %v2886_v42, %v2627_v41  ;;  %v2628_v55 = vmax.f32 %v1728_v43, 0.0  ;;  %v3033_v44 = vadd.f32 %v3032_v25, %v2753_v4  ;;  %v2757_v9 = vmax.f32 %v2245_v34, 0.0  ;;  %v2252_v18 = vpop.f32.mrb[41].mxu1 }
 0x144   : > { %v2756_v61 = vmax.f32 %v2240_v53, 0.0  ;;  %v2758_v4 = vmax.f32 %v2248_v52, 0.0  ;;  %v2253_v27 = vadd.f32 %v4632_v46, %v2252_v18  ;;  %v3969_v29 = vpop.f32.mrb[42].mxu1 }
 0x145   : > { %v2888_v63 = vadd.f32 %v2887_v54, %v2628_v55  ;;  %v3840_v1 = vpop.f32.mrb[44].mxu0  ;;  %v3034_v58 = vadd.f32 %v3033_v44, %v2754_v15  ;;  %v2255_v34 = vpop.f32.mrb[43].mxu1 }
 0x146   : > { %v1740_v16 = vpop.f32.mrb[45].mxu0  ;;  %v1749_v31 = vadd.f32 %v3840_v1, %v4632_v46  ;;  %v2256_v52 = vadd.f32 %v4632_v46, %v2255_v34 }
 0x147   : > { %v2889_v19 = vadd.f32 %v2888_v63, %v2629_v62  ;;  %v1741_v22 = vadd.f32 %v4632_v46, %v1740_v16  ;;  %v3841_v23 = vpop.f32.mrb[46].mxu0  ;;  %v3035_v12 = vadd.f32 %v3034_v58, %v2755_v49  ;;  %v2264_v49 = vadd.f32 %v3969_v29, %v4632_v46  ;;  %v4249_v58 = vld [vmem:[%s5135_s3 + $0x20] sm:$0xff]  }
 0x148   : > { %v1743_v32 = vpop.f32.mrb[47].mxu0  ;;  %v1752_v48 = vadd.f32 %v3841_v23, %v4632_v46  ;;  %v2633_v62 = vmax.f32 %v1749_v31, 0.0  ;;  %4059 = vmatpush3.bf16.msra.mxu1 %v4249_v58 }
 0x149   : > { %v2631_v41 = vmax.f32 %v1741_v22, 0.0  ;;  %v2890_v42 = vadd.f32 %v2889_v19, %v2630_v14  ;;  %v1744_v43 = vadd.f32 %v4632_v46, %v1743_v32  ;;  %v3036_v25 = vadd.f32 %v3035_v12, %v2756_v61  ;;  %4060 = vmatprep.subr.bf16.mxu1 %v4319_v37 }
 0x14a   : > { %v2634_v14 = vmax.f32 %v1752_v48, 0.0  ;;  %v2261_v32 = vadd.f32 %v3968_v13, %v4632_v46  ;;  %v2759_v48 = vmax.f32 %v2253_v27, 0.0  ;;  %v2760_v61 = vmax.f32 %v2256_v52, 0.0  ;;  %v3972_v13 = vpop.f32.mrb[44].mxu1 }
 0x14b   : > { %v2891_v54 = vadd.f32 %v2890_v42, %v2631_v41  ;;  %v2632_v55 = vmax.f32 %v1744_v43, 0.0  ;;  %v3037_v43 = vadd.f32 %v3036_v25, %v2757_v9  ;;  %v2762_v18 = vmax.f32 %v2264_v49, 0.0 }
 0x14c   : > { %v2761_v12 = vmax.f32 %v2261_v32, 0.0  ;;  %v2277_v32 = vadd.f32 %v3972_v13, %v4632_v46 }
 0x14d   : > { %v2892_v63 = vadd.f32 %v2891_v54, %v2632_v55  ;;  %v3844_v1 = vpop.f32.mrb[48].mxu0  ;;  %v3038_v55 = vadd.f32 %v3037_v43, %v2758_v4 }
 0x14e   : > { %v1756_v16 = vpop.f32.mrb[49].mxu0  ;;  %v1765_v15 = vadd.f32 %v3844_v1, %v4632_v46 }
 0x14f   : > { %v2893_v19 = vadd.f32 %v2892_v63, %v2633_v62  ;;  %v1757_v22 = vadd.f32 %v4632_v46, %v1756_v16  ;;  %v3845_v23 = vpop.f32.mrb[50].mxu0  ;;  %v3039_v9 = vadd.f32 %v3038_v55, %v2759_v48 }
 0x150   : > { %v1759_v31 = vpop.f32.mrb[51].mxu0  ;;  %v1768_v44 = vadd.f32 %v3845_v23, %v4632_v46  ;;  %v2637_v62 = vmax.f32 %v1765_v15, 0.0 }
 0x151   : > { %v2635_v38 = vmax.f32 %v1757_v22, 0.0  ;;  %v2894_v41 = vadd.f32 %v2893_v19, %v2634_v14  ;;  %v1760_v42 = vadd.f32 %v4632_v46, %v1759_v31  ;;  %v2268_v19 = vpop.f32.mrb[45].mxu1  ;;  %v3040_v25 = vadd.f32 %v3039_v9, %v2760_v61 }
 0x152   : > { %v2638_v14 = vmax.f32 %v1768_v44, 0.0  ;;  %v2269_v27 = vadd.f32 %v4632_v46, %v2268_v19  ;;  %v3973_v29 = vpop.f32.mrb[46].mxu1 }
 0x153   : > { %v2895_v53 = vadd.f32 %v2894_v41, %v2635_v38  ;;  %v2636_v54 = vmax.f32 %v1760_v42, 0.0  ;;  %v2271_v34 = vpop.f32.mrb[47].mxu1  ;;  %v3041_v43 = vadd.f32 %v3040_v25, %v2761_v12  ;;  %v2280_v49 = vadd.f32 %v3973_v29, %v4632_v46 }
 0x154   : > { %v2763_v48 = vmax.f32 %v2269_v27, 0.0  ;;  %v2272_v52 = vadd.f32 %v4632_v46, %v2271_v34  ;;  %v3976_v13 = vpop.f32.mrb[48].mxu1 }
 0x155   : > { %v2896_v63 = vadd.f32 %v2895_v53, %v2636_v54  ;;  %v3848_v1 = vpop.f32.mrb[52].mxu0  ;;  %v3042_v55 = vadd.f32 %v3041_v43, %v2762_v18  ;;  %v2766_v12 = vmax.f32 %v2280_v49, 0.0  ;;  %v2284_v19 = vpop.f32.mrb[49].mxu1  ;;  %v2874_v18 = vrot.slane %v4775_v6, 4 }
 0x156   : > { %v1772_v16 = vpop.f32.mrb[53].mxu0  ;;  %v1781_v15 = vadd.f32 %v3848_v1, %v4632_v46  ;;  %v2764_v58 = vmax.f32 %v2272_v52, 0.0  ;;  %v2765_v1 = vmax.f32 %v2277_v32, 0.0  ;;  %v2285_v27 = vadd.f32 %v4632_v46, %v2284_v19  ;;  %v3977_v29 = vpop.f32.mrb[50].mxu1 }
 0x157   : > { %v2897_v22 = vadd.f32 %v2896_v63, %v2637_v62  ;;  %v1773_v4 = vadd.f32 %v4632_v46, %v1772_v16  ;;  %v3849_v23 = vpop.f32.mrb[54].mxu0  ;;  %v3043_v9 = vadd.f32 %v3042_v55, %v2763_v48  ;;  %v2293_v32 = vadd.f32 %v3976_v13, %v4632_v46  ;;  %v2287_v34 = vpop.f32.mrb[51].mxu1 }
 0x158   : > { %v1775_v31 = vpop.f32.mrb[55].mxu0  ;;  %v1784_v44 = vadd.f32 %v3849_v23, %v4632_v46  ;;  %v2641_v61 = vmax.f32 %v1781_v15, 0.0  ;;  %v2767_v48 = vmax.f32 %v2285_v27, 0.0  ;;  %v2296_v49 = vadd.f32 %v3977_v29, %v4632_v46 }
 0x159   : > { %v2639_v38 = vmax.f32 %v1773_v4, 0.0  ;;  %v2898_v41 = vadd.f32 %v2897_v22, %v2638_v14  ;;  %v1776_v42 = vadd.f32 %v4632_v46, %v1775_v31  ;;  %v3044_v25 = vadd.f32 %v3043_v9, %v2764_v58 }
 0x15a   : > { %v2642_v14 = vmax.f32 %v1784_v44, 0.0  ;;  %v2288_v52 = vadd.f32 %v4632_v46, %v2287_v34  ;;  %v2875_v58 = vadd.f32 %v2874_v18, %v4775_v6  ;;  %v2769_v13 = vmax.f32 %v2293_v32, 0.0 }
 0x15b   : > { %v2899_v53 = vadd.f32 %v2898_v41, %v2639_v38  ;;  %v2640_v54 = vmax.f32 %v1776_v42, 0.0  ;;  %v3045_v43 = vadd.f32 %v3044_v25, %v2765_v1 }
 0x15c   : > { %v2876_v6 = vrot.slane %v2875_v58, 2 }
 0x15d   : > { %v2900_v62 = vadd.f32 %v2899_v53, %v2640_v54  ;;  %v3852_v63 = vpop.f32.mrb[56].mxu0  ;;  %v3046_v55 = vadd.f32 %v3045_v43, %v2766_v12 }
 0x15e   : > { %v1788_v16 = vpop.f32.mrb[57].mxu0  ;;  %v1797_v15 = vadd.f32 %v3852_v63, %v4632_v46 }
 0x15f   : > { %v2901_v22 = vadd.f32 %v2900_v62, %v2641_v61  ;;  %v1789_v4 = vadd.f32 %v4632_v46, %v1788_v16  ;;  %v3853_v23 = vpop.f32.mrb[58].mxu0  ;;  %v2768_v61 = vmax.f32 %v2288_v52, 0.0  ;;  %v3980_v16 = vpop.f32.mrb[52].mxu1 }
 0x160   : > { %v1791_v31 = vpop.f32.mrb[59].mxu0  ;;  %v1800_v44 = vadd.f32 %v3853_v23, %v4632_v46  ;;  %v2645_v62 = vmax.f32 %v1797_v15, 0.0  ;;  %v2309_v32 = vadd.f32 %v3980_v16, %v4632_v46 }
 0x161   : > { %v2643_v38 = vmax.f32 %v1789_v4, 0.0  ;;  %v2902_v41 = vadd.f32 %v2901_v22, %v2642_v14  ;;  %v1792_v42 = vadd.f32 %v4632_v46, %v1791_v31  ;;  %v3047_v14 = vadd.f32 %v3046_v55, %v2767_v48  ;;  %v2300_v4 = vpop.f32.mrb[53].mxu1 }
 0x162   : > { %v2646_v1 = vmax.f32 %v1800_v44, 0.0  ;;  %v2770_v22 = vmax.f32 %v2296_v49, 0.0  ;;  %v2301_v12 = vadd.f32 %v4632_v46, %v2300_v4  ;;  %v3981_v31 = vpop.f32.mrb[54].mxu1  ;;  %v2773_v16 = vmax.f32 %v2309_v32, 0.0 }
 0x163   : > { %v2903_v53 = vadd.f32 %v2902_v41, %v2643_v38  ;;  %v2644_v54 = vmax.f32 %v1792_v42, 0.0  ;;  %v3048_v29 = vadd.f32 %v3047_v14, %v2768_v61  ;;  %v2303_v34 = vpop.f32.mrb[55].mxu1  ;;  %v2312_v49 = vadd.f32 %v3981_v31, %v4632_v46 }
 0x164   : > { %v2771_v48 = vmax.f32 %v2301_v12, 0.0  ;;  %v2304_v52 = vadd.f32 %v4632_v46, %v2303_v34  ;;  %v2877_v61 = vadd.f32 %v2876_v6, %v2875_v58 }
 0x165   : > { %v2904_v63 = vadd.f32 %v2903_v53, %v2644_v54  ;;  %v3856_v9 = vpop.f32.mrb[60].mxu0  ;;  %v3049_v43 = vadd.f32 %v3048_v29, %v2769_v13 }
 0x166   : > { %v1804_v19 = vpop.f32.mrb[61].mxu0  ;;  %v1813_v18 = vadd.f32 %v3856_v9, %v4632_v46  ;;  %v2878_v58 = vrot.slane %v2877_v61, 1 }
 0x167   : > { %v2905_v23 = vadd.f32 %v2904_v63, %v2645_v62  ;;  %v1805_v25 = vadd.f32 %v4632_v46, %v1804_v19  ;;  %v3857_v27 = vpop.f32.mrb[62].mxu0  ;;  %v3050_v55 = vadd.f32 %v3049_v43, %v2770_v22  ;;  %v2772_v62 = vmax.f32 %v2304_v52, 0.0  ;;  %v3984_v19 = vpop.f32.mrb[56].mxu1 }
 0x168   : > { %v1807_v15 = vpop.f32.mrb[63].mxu0  ;;  %v1816_v44 = vadd.f32 %v3857_v27, %v4632_v46  ;;  %v2649_v63 = vmax.f32 %v1813_v18, 0.0  ;;  %v2325_v43 = vadd.f32 %v3984_v19, %v4632_v46 }
 0x169   : > { %v2647_v38 = vmax.f32 %v1805_v25, 0.0  ;;  %v2906_v41 = vadd.f32 %v2905_v23, %v2646_v1  ;;  %v1808_v42 = vadd.f32 %v4632_v46, %v1807_v15  ;;  %v3051_v1 = vadd.f32 %v3050_v55, %v2771_v48  ;;  %v2316_v25 = vpop.f32.mrb[57].mxu1 }
 0x16a   : > { %v2650_v4 = vmax.f32 %v1816_v44, 0.0  ;;  %v2774_v23 = vmax.f32 %v2312_v49, 0.0  ;;  %v2317_v15 = vadd.f32 %v4632_v46, %v2316_v25  ;;  %v3985_v22 = vpop.f32.mrb[58].mxu1  ;;  %v2879_v55 = vadd.f32 %v2878_v58, %v2877_v61 }
 0x16b   : > { %v2907_v53 = vadd.f32 %v2906_v41, %v2647_v38  ;;  %v2648_v54 = vmax.f32 %v1808_v42, 0.0  ;;  %v3052_v31 = vadd.f32 %v3051_v1, %v2772_v62  ;;  %v2319_v18 = vpop.f32.mrb[59].mxu1  ;;  %v2328_v62 = vadd.f32 %v3985_v22, %v4632_v46 }
 0x16c   : > { %v2775_v44 = vmax.f32 %v2317_v15, 0.0  ;;  %v2320_v48 = vadd.f32 %v4632_v46, %v2319_v18  ;;  %v2777_v19 = vmax.f32 %v2325_v43, 0.0  ;;  %v3139_v58 = vmul.f32 0.00390625, %v2879_v55 }
 0x16d   : > { %v2908_v9 = vadd.f32 %v2907_v53, %v2648_v54  ;;  %v3860_v14 = vpop.f32.mrb[64].mxu0  ;;  %v3053_v41 = vadd.f32 %v3052_v31, %v2773_v16 }
 0x16e   : > { %v1820_v13 = vpop.f32.mrb[65].mxu0  ;;  %v1829_v32 = vadd.f32 %v3860_v14, %v4632_v46 }
 0x16f   : > { %v2909_v27 = vadd.f32 %v2908_v9, %v2649_v63  ;;  %v1821_v29 = vadd.f32 %v4632_v46, %v1820_v13  ;;  %v3861_v12 = vpop.f32.mrb[66].mxu0  ;;  %v3054_v54 = vadd.f32 %v3053_v41, %v2774_v23  ;;  %v2776_v63 = vmax.f32 %v2320_v48, 0.0  ;;  %v3988_v13 = vpop.f32.mrb[60].mxu1 }
 0x170   : > { %v1823_v6 = vpop.f32.mrb[67].mxu0  ;;  %v1832_v42 = vadd.f32 %v3861_v12, %v4632_v46  ;;  %v2653_v14 = vmax.f32 %v1829_v32, 0.0  ;;  %v2332_v12 = vpop.f32.mrb[61].mxu1 }
 0x171   : > { %v2910_v34 = vadd.f32 %v2909_v27, %v2650_v4  ;;  %v1824_v38 = vadd.f32 %v4632_v46, %v1823_v6  ;;  %v2651_v52 = vmax.f32 %v1821_v29, 0.0  ;;  %v3055_v16 = vadd.f32 %v3054_v54, %v2775_v44  ;;  %v3989_v61 = vpop.f32.mrb[62].mxu1 }
 0x172   : > { %v2654_v25 = vmax.f32 %v1832_v42, 0.0  ;;  %v2333_v32 = vadd.f32 %v4632_v46, %v2332_v12  ;;  %v3147_v12 = vpack.c.bf16 %v3139_v58, %v3139_v58 }
 0x173   : > { %v2911_v49 = vrot.slane %v2910_v34, 4  ;;  %v2652_v53 = vmax.f32 %v1824_v38, 0.0  ;;  %v3056_v23 = vadd.f32 %v3055_v16, %v2776_v63  ;;  %v2335_v38 = vpop.f32.mrb[63].mxu1 }
 0x175   : > { %v2912_v9 = vadd.f32 %v2911_v49, %v2910_v34  ;;  %v2917_v1 = vadd.f32 %v2652_v53, %v2651_v52  ;;  %v3864_v4 = vpop.f32.mrb[68].mxu0  ;;  %v2778_v34 = vmax.f32 %v2328_v62, 0.0  ;;  %v3057_v49 = vadd.f32 %v3056_v23, %v2777_v19  ;;  %v3992_v19 = vpop.f32.mrb[64].mxu1 }
 0x176   : > { %v1836_v27 = vpop.f32.mrb[69].mxu0  ;;  %v1845_v22 = vadd.f32 %v3864_v4, %v4632_v46  ;;  %v2341_v52 = vadd.f32 %v3988_v13, %v4632_v46  ;;  %v2779_v53 = vmax.f32 %v2333_v32, 0.0 }
 0x177   : > { %v2913_v31 = vrot.slane %v2912_v9, 2  ;;  %v2918_v15 = vadd.f32 %v2917_v1, %v2653_v14  ;;  %v1837_v29 = vadd.f32 %v4632_v46, %v1836_v27  ;;  %v3865_v6 = vpop.f32.mrb[70].mxu0  ;;  %v2336_v14 = vadd.f32 %v4632_v46, %v2335_v38 }
 0x178   : > { %v1839_v18 = vpop.f32.mrb[71].mxu0  ;;  %v1848_v48 = vadd.f32 %v3865_v6, %v4632_v46  ;;  %v4861_v62 = vadd.f32 %v3057_v49, %v2778_v34  ;;  %v2657_v16 = vmax.f32 %v1845_v22, 0.0  ;;  %v3186_v49 = vunpack.c.l.b16 %v3147_v12 }
 0x179   : > { %v2914_v41 = vadd.f32 %v2913_v31, %v2912_v9  ;;  %v2655_v42 = vmax.f32 %v1837_v29, 0.0  ;;  %v2919_v44 = vadd.f32 %v2918_v15, %v2654_v25  ;;  %v1840_v43 = vadd.f32 %v4632_v46, %v1839_v18  ;;  %v4866_v9 = vld [vmem:[%s5134_s2] ss:$0 sm:$0xff]  ;;  %v2348_v46 = vpop.f32.mrb[65].mxu1 }
 0x17a   : > { %v2344_v1 = vadd.f32 %v4866_v9, %v3989_v61  ;;  %v2780_v13 = vmax.f32 %v2336_v14, 0.0  ;;  %v2658_v31 = vmax.f32 %v1848_v48, 0.0  ;;  %v2781_v29 = vmax.f32 %v2341_v52, 0.0  ;;  %v3993_v38 = vpop.f32.mrb[66].mxu1 }
 0x17b   : > { %v2915_v54 = vrot.slane %v2914_v41, 1  ;;  %v2920_v55 = vadd.f32 %v2919_v44, %v2655_v42  ;;  %v2656_v63 = vmax.f32 %v1840_v43, 0.0  ;;  %v2351_v42 = vpop.f32.mrb[67].mxu1 }
 0x17c   : > { %v3065_v32 = vadd.f32 %v2780_v13, %v2779_v53 }
 0x17d   : > { %v2916_v4 = vadd.f32 %v2915_v54, %v2914_v41  ;;  %v2921_v25 = vadd.f32 %v2920_v55, %v2656_v63  ;;  %v3868_v27 = vpop.f32.mrb[72].mxu0  ;;  %v2782_v41 = vmax.f32 %v2344_v1, 0.0  ;;  %v2357_v54 = vadd.f32 %v4866_v9, %v3992_v19  ;;  %v3996_v19 = vpop.f32.mrb[68].mxu1 }
 0x17e   : > { %v1852_v15 = vpop.f32.mrb[73].mxu0  ;;  %v1861_v61 = vadd.f32 %v4866_v9, %v3868_v27  ;;  %v3066_v52 = vadd.f32 %v3065_v32, %v2781_v29  ;;  %v2349_v55 = vadd.f32 %v4866_v9, %v2348_v46  ;;  %v2360_v1 = vadd.f32 %v4866_v9, %v3993_v38  ;;  %v4250_v29 = vld [vmem:[%s5135_s3 + $0x28] sm:$0xff]  }
 0x17f   : > { %v3140_v6 = vmul.f32 0.00390625, %v2916_v4  ;;  %v2922_v23 = vadd.f32 %v2921_v25, %v2657_v16  ;;  %v1853_v18 = vadd.f32 %v4866_v9, %v1852_v15  ;;  %v3869_v34 = vpop.f32.mrb[74].mxu0  ;;  %v2352_v27 = vadd.f32 %v4866_v9, %v2351_v42  ;;  %4061 = vmatpush3.bf16.msra.mxu1 %v4250_v29 }
 0x180   : > { %v1855_v22 = vpop.f32.mrb[75].mxu0  ;;  %v1864_v14 = vadd.f32 %v4866_v9, %v3869_v34  ;;  %v2783_v16 = vmax.f32 %v2349_v55, 0.0  ;;  %v3067_v25 = vadd.f32 %v3066_v52, %v2782_v41  ;;  %v2661_v12 = vmax.f32 %v1861_v61, 0.0  ;;  %v2364_v34 = vpop.f32.mrb[69].mxu1  ;;  %4062 = vmatprep.subr.bf16.mxu1 %v4319_v37 }
 0x181   : > { %v3148_v44 = vpack.c.bf16 %v3140_v6, %v3140_v6  ;;  %v2659_v43 = vmax.f32 %v1853_v18, 0.0  ;;  %v2923_v58 = vadd.f32 %v2922_v23, %v2658_v31  ;;  %v1856_v48 = vadd.f32 %v4866_v9, %v1855_v22  ;;  %v3997_v61 = vpop.f32.mrb[70].mxu1 }
 0x182   : > { %v2785_v6 = vmax.f32 %v2357_v54, 0.0  ;;  %v3068_v23 = vadd.f32 %v3067_v25, %v2783_v16  ;;  %v2784_v18 = vmax.f32 %v2352_v27, 0.0  ;;  %v2662_v32 = vmax.f32 %v1864_v14, 0.0 }
 0x183   : > { %v3187_v63 = vunpack.c.l.b16 %v3148_v44  ;;  %v2924_v53 = vadd.f32 %v2923_v58, %v2659_v43  ;;  %v2660_v4 = vmax.f32 %v1856_v48, 0.0  ;;  %v2365_v42 = vadd.f32 %v4866_v9, %v2364_v34  ;;  %v2367_v48 = vpop.f32.mrb[71].mxu1 }
 0x184   : > { %v2786_v43 = vmax.f32 %v2360_v1, 0.0  ;;  %v3069_v58 = vadd.f32 %v3068_v23, %v2784_v18  ;;  %v2368_v1 = vadd.f32 %v4866_v9, %v2367_v48  ;;  %v4000_v23 = vpop.f32.mrb[72].mxu1 }
 0x185   : > { %v4878_v13 = vsel %vm3194_vm1, %v3187_v63, %v3186_v49  ;;  %v2925_v31 = vadd.f32 %v2924_v53, %v2660_v4  ;;  %v3872_v15 = vpop.f32.mrb[76].mxu0  ;;  %v2373_v53 = vadd.f32 %v4866_v9, %v3996_v19  ;;  %v2787_v14 = vmax.f32 %v2365_v42, 0.0 }
 0x186   : > { %v1868_v46 = vpop.f32.mrb[77].mxu0  ;;  %v1877_v49 = vadd.f32 %v4866_v9, %v3872_v15  ;;  %v3070_v63 = vadd.f32 %v3069_v58, %v2785_v6 }
 0x187   : > { %v2926_v38 = vadd.f32 %v2925_v31, %v2661_v12  ;;  %v1869_v22 = vadd.f32 %v4866_v9, %v1868_v46  ;;  %v3873_v41 = vpop.f32.mrb[78].mxu0  ;;  %v2376_v12 = vadd.f32 %v4866_v9, %v3997_v61  ;;  %v2788_v46 = vmax.f32 %v2368_v1, 0.0 }
 0x188   : > { %v1871_v44 = vpop.f32.mrb[79].mxu0  ;;  %v1880_v16 = vadd.f32 %v4866_v9, %v3873_v41  ;;  %v3071_v27 = vadd.f32 %v3070_v63, %v2786_v43  ;;  %v2665_v31 = vmax.f32 %v1877_v49, 0.0  ;;  %v2789_v34 = vmax.f32 %v2373_v53, 0.0 }
 0x189   : > { %v2663_v52 = vmax.f32 %v1869_v22, 0.0  ;;  %v2927_v54 = vadd.f32 %v2926_v38, %v2662_v32  ;;  %v1872_v55 = vadd.f32 %v4866_v9, %v1871_v44  ;;  %v2380_v32 = vpop.f32.mrb[73].mxu1  ;;  %v2790_v58 = vmax.f32 %v2376_v12, 0.0 }
 0x18a   : > { %v3072_v6 = vadd.f32 %v3071_v27, %v2787_v14  ;;  %v2666_v19 = vmax.f32 %v1880_v16, 0.0  ;;  %v2381_v42 = vadd.f32 %v4866_v9, %v2380_v32  ;;  %v4001_v44 = vpop.f32.mrb[74].mxu1  ;;  %v2389_v53 = vadd.f32 %v4866_v9, %v4000_v23 }
 0x18b   : > { %v2928_v4 = vadd.f32 %v2927_v54, %v2663_v52  ;;  %v2664_v25 = vmax.f32 %v1872_v55, 0.0  ;;  %v2383_v48 = vpop.f32.mrb[75].mxu1  ;;  %v2392_v12 = vadd.f32 %v4866_v9, %v4001_v44 }
 0x18c   : > { %v3073_v61 = vadd.f32 %v3072_v6, %v2788_v46  ;;  %v2791_v14 = vmax.f32 %v2381_v42, 0.0  ;;  %v2793_v32 = vmax.f32 %v2389_v53, 0.0 }
 0x18d   : > { %v2929_v29 = vadd.f32 %v2928_v4, %v2664_v25  ;;  %v3876_v15 = vpop.f32.mrb[80].mxu0  ;;  %v2384_v4 = vadd.f32 %v4866_v9, %v2383_v48 }
 0x18e   : > { %v1884_v18 = vpop.f32.mrb[81].mxu0  ;;  %v1893_v49 = vadd.f32 %v4866_v9, %v3876_v15  ;;  %v3074_v63 = vadd.f32 %v3073_v61, %v2789_v34  ;;  %v2794_v61 = vmax.f32 %v2392_v12, 0.0 }
 0x18f   : > { %v2930_v38 = vadd.f32 %v2929_v29, %v2665_v31  ;;  %v1885_v22 = vadd.f32 %v4866_v9, %v1884_v18  ;;  %v3877_v41 = vpop.f32.mrb[82].mxu0  ;;  %v2792_v31 = vmax.f32 %v2384_v4, 0.0  ;;  %v4004_v18 = vpop.f32.mrb[76].mxu1 }
 0x190   : > { %v1887_v43 = vpop.f32.mrb[83].mxu0  ;;  %v1896_v25 = vadd.f32 %v4866_v9, %v3877_v41  ;;  %v3075_v27 = vadd.f32 %v3074_v63, %v2790_v58  ;;  %v2669_v29 = vmax.f32 %v1893_v49, 0.0  ;;  %v2405_v63 = vadd.f32 %v4866_v9, %v4004_v18 }
 0x191   : > { %v2667_v52 = vmax.f32 %v1885_v22, 0.0  ;;  %v2931_v54 = vadd.f32 %v2930_v38, %v2666_v19  ;;  %v1888_v55 = vadd.f32 %v4866_v9, %v1887_v43  ;;  %v2396_v19 = vpop.f32.mrb[77].mxu1 }
 0x192   : > { %v3076_v34 = vadd.f32 %v3075_v27, %v2791_v14  ;;  %v2670_v23 = vmax.f32 %v1896_v25, 0.0  ;;  %v2397_v41 = vadd.f32 %v4866_v9, %v2396_v19  ;;  %v4005_v43 = vpop.f32.mrb[78].mxu1 }
 0x193   : > { %v2932_v16 = vadd.f32 %v2931_v54, %v2667_v52  ;;  %v2668_v1 = vmax.f32 %v1888_v55, 0.0  ;;  %v2399_v49 = vpop.f32.mrb[79].mxu1 }
 0x194   : > { %v3077_v48 = vadd.f32 %v3076_v34, %v2792_v31  ;;  %v2795_v4 = vmax.f32 %v2397_v41, 0.0 }
 0x195   : > { %v2933_v15 = vadd.f32 %v2932_v16, %v2668_v1  ;;  %v3880_v46 = vpop.f32.mrb[84].mxu0  ;;  %v2400_v16 = vadd.f32 %v4866_v9, %v2399_v49 }
 0x196   : > { %v1900_v6 = vpop.f32.mrb[85].mxu0  ;;  %v1909_v58 = vadd.f32 %v4866_v9, %v3880_v46  ;;  %v3078_v14 = vadd.f32 %v3077_v48, %v2793_v32 }
 0x197   : > { %v2934_v38 = vadd.f32 %v2933_v15, %v2669_v29  ;;  %v1901_v22 = vadd.f32 %v4866_v9, %v1900_v6  ;;  %v3881_v42 = vpop.f32.mrb[86].mxu0  ;;  %v2408_v29 = vadd.f32 %v4866_v9, %v4005_v43  ;;  %v2796_v12 = vmax.f32 %v2400_v16, 0.0  ;;  %v4008_v6 = vpop.f32.mrb[80].mxu1  ;;  %v4251_v43 = vld [vmem:[%s5135_s3 + $0x30] sm:$0xff]  }
 0x198   : > { %v1903_v44 = vpop.f32.mrb[87].mxu0  ;;  %v1912_v53 = vadd.f32 %v4866_v9, %v3881_v42  ;;  %v3079_v27 = vadd.f32 %v3078_v14, %v2794_v61  ;;  %v2673_v31 = vmax.f32 %v1909_v58, 0.0  ;;  %4063 = vmatpush3.bf16.msra.mxu1 %v4251_v43 }
 0x199   : > { %v2671_v52 = vmax.f32 %v1901_v22, 0.0  ;;  %v2935_v54 = vadd.f32 %v2934_v38, %v2670_v23  ;;  %v1904_v55 = vadd.f32 %v4866_v9, %v1903_v44  ;;  %v2797_v23 = vmax.f32 %v2405_v63, 0.0  ;;  %v2412_v38 = vpop.f32.mrb[81].mxu1  ;;  %4064 = vmatprep.subr.bf16.mxu1 %v4319_v37 }
 0x19a   : > { %v2674_v34 = vmax.f32 %v1912_v53, 0.0  ;;  %v3080_v18 = vadd.f32 %v3079_v27, %v2795_v4  ;;  %v2413_v41 = vadd.f32 %v4866_v9, %v2412_v38  ;;  %v4009_v44 = vpop.f32.mrb[82].mxu1  ;;  %v2798_v61 = vmax.f32 %v2408_v29, 0.0  ;;  %v4252_v53 = vld [vmem:[%s5135_s3 + $0x38] sm:$0xff]  }
 0x19b   : > { %v2936_v25 = vadd.f32 %v2935_v54, %v2671_v52  ;;  %v2672_v1 = vmax.f32 %v1904_v55, 0.0  ;;  %v2415_v49 = vpop.f32.mrb[83].mxu1  ;;  %v2421_v4 = vadd.f32 %v4866_v9, %v4008_v6 }
 0x19c   : > { %v3081_v48 = vadd.f32 %v3080_v18, %v2796_v12  ;;  %v2799_v16 = vmax.f32 %v2413_v41, 0.0  ;;  %v4012_v18 = vpop.f32.mrb[84].mxu1  ;;  %4065 = vmatpush3.bf16.msra.mxu1 %v4252_v53 }
 0x19d   : > { %v2937_v15 = vadd.f32 %v2936_v25, %v2672_v1  ;;  %v3884_v46 = vpop.f32.mrb[88].mxu0  ;;  %v2416_v25 = vadd.f32 %v4866_v9, %v2415_v49  ;;  %v2801_v6 = vmax.f32 %v2421_v4, 0.0 }
 0x19e   : > { %v1916_v19 = vpop.f32.mrb[89].mxu0  ;;  %v1925_v52 = vadd.f32 %v4866_v9, %v3884_v46  ;;  %v3082_v14 = vadd.f32 %v3081_v48, %v2797_v23 }
 0x19f   : > { %v2938_v22 = vadd.f32 %v2937_v15, %v2673_v31  ;;  %v1917_v32 = vadd.f32 %v4866_v9, %v1916_v19  ;;  %v3885_v42 = vpop.f32.mrb[90].mxu0  ;;  %v2424_v31 = vadd.f32 %v4866_v9, %v4009_v44  ;;  %v2800_v15 = vmax.f32 %v2416_v25, 0.0 }
 0x1a0   : > { %v1919_v58 = vpop.f32.mrb[91].mxu0  ;;  %v1928_v27 = vadd.f32 %v4866_v9, %v3885_v42  ;;  %v3083_v12 = vadd.f32 %v3082_v14, %v2798_v61  ;;  %v2677_v46 = vmax.f32 %v1925_v52, 0.0  ;;  %v2437_v14 = vadd.f32 %v4866_v9, %v4012_v18 }
 0x1a1   : > { %v2675_v54 = vmax.f32 %v1917_v32, 0.0  ;;  %v2939_v55 = vadd.f32 %v2938_v22, %v2674_v34  ;;  %v1920_v63 = vadd.f32 %v4866_v9, %v1919_v58  ;;  %v2428_v22 = vpop.f32.mrb[85].mxu1  ;;  %v2802_v44 = vmax.f32 %v2424_v31, 0.0 }
 0x1a2   : > { %v3084_v38 = vadd.f32 %v3083_v12, %v2799_v16  ;;  %v2678_v32 = vmax.f32 %v1928_v27, 0.0  ;;  %v2429_v42 = vadd.f32 %v4866_v9, %v2428_v22  ;;  %v4013_v58 = vpop.f32.mrb[86].mxu1 }
 0x1a3   : > { %v2940_v1 = vadd.f32 %v2939_v55, %v2675_v54  ;;  %v2676_v29 = vmax.f32 %v1920_v63, 0.0  ;;  %v2431_v49 = vpop.f32.mrb[87].mxu1  ;;  %v2440_v12 = vadd.f32 %v4866_v9, %v4013_v58 }
 0x1a4   : > { %v3085_v48 = vadd.f32 %v3084_v38, %v2800_v15  ;;  %v2803_v4 = vmax.f32 %v2429_v42, 0.0  ;;  %v2432_v16 = vadd.f32 %v4866_v9, %v2431_v49  ;;  %v2805_v38 = vmax.f32 %v2437_v14, 0.0 }
 0x1a5   : > { %v2941_v34 = vadd.f32 %v2940_v1, %v2676_v29  ;;  %v3888_v19 = vpop.f32.mrb[92].mxu0 }
 0x1a6   : > { %v1932_v23 = vpop.f32.mrb[93].mxu0  ;;  %v1941_v52 = vadd.f32 %v4866_v9, %v3888_v19  ;;  %v3086_v53 = vadd.f32 %v3085_v48, %v2801_v6  ;;  %v2804_v31 = vmax.f32 %v2432_v16, 0.0  ;;  %v4016_v19 = vpop.f32.mrb[88].mxu1 }
 0x1a7   : > { %v2942_v41 = vadd.f32 %v2941_v34, %v2677_v46  ;;  %v1933_v37 = vadd.f32 %v4866_v9, %v1932_v23  ;;  %v3889_v43 = vpop.f32.mrb[94].mxu0  ;;  %v2444_v22 = vpop.f32.mrb[89].mxu1 }
 0x1a8   : > { %v1935_v61 = vpop.f32.mrb[95].mxu0  ;;  %v1944_v1 = vadd.f32 %v4866_v9, %v3889_v43  ;;  %v3087_v29 = vadd.f32 %v3086_v53, %v2802_v44  ;;  %v2681_v15 = vmax.f32 %v1941_v52, 0.0  ;;  %v2445_v43 = vadd.f32 %v4866_v9, %v2444_v22  ;;  %v4017_v42 = vpop.f32.mrb[90].mxu1 }
 0x1a9   : > { %v2679_v54 = vmax.f32 %v1933_v37, 0.0  ;;  %v2943_v55 = vadd.f32 %v2942_v41, %v2678_v32  ;;  %v1936_v63 = vadd.f32 %v4866_v9, %v1935_v61  ;;  %v2806_v44 = vmax.f32 %v2440_v12, 0.0  ;;  %v2447_v48 = vpop.f32.mrb[91].mxu1 }
 0x1aa   : > { %v3088_v6 = vadd.f32 %v3087_v29, %v2803_v4  ;;  %v2682_v18 = vmax.f32 %v1944_v1, 0.0  ;;  %v2807_v14 = vmax.f32 %v2445_v43, 0.0  ;;  %v2448_v4 = vadd.f32 %v4866_v9, %v2447_v48 }
 0x1ab   : > { %v2944_v25 = vadd.f32 %v2943_v55, %v2679_v54  ;;  %v2680_v27 = vmax.f32 %v1936_v63, 0.0  ;;  %v2453_v55 = vadd.f32 %v4866_v9, %v4016_v19  ;;  %v2456_v29 = vadd.f32 %v4866_v9, %v4017_v42 }
 0x1ac   : > { %v3089_v58 = vadd.f32 %v3088_v6, %v2804_v31  ;;  %v2808_v12 = vmax.f32 %v2448_v4, 0.0 }
 0x1ad   : > { %v2945_v46 = vadd.f32 %v2944_v25, %v2680_v27  ;;  %v3892_v34 = vpop.f32.mrb[96].mxu0  ;;  %v2809_v22 = vmax.f32 %v2453_v55, 0.0  ;;  %v2810_v48 = vmax.f32 %v2456_v29, 0.0 }
 0x1ae   : > { %v1948_v23 = vpop.f32.mrb[97].mxu0  ;;  %v1957_v52 = vadd.f32 %v4866_v9, %v3892_v34  ;;  %v3090_v53 = vadd.f32 %v3089_v58, %v2805_v38 }
 0x1af   : > { %v2946_v32 = vadd.f32 %v2945_v46, %v2681_v15  ;;  %v1949_v41 = vadd.f32 %v4866_v9, %v1948_v23  ;;  %v3893_v37 = vpop.f32.mrb[98].mxu0  ;;  %v4020_v23 = vpop.f32.mrb[92].mxu1 }
 0x1b0   : > { %v1951_v61 = vpop.f32.mrb[99].mxu0  ;;  %v1960_v63 = vadd.f32 %v4866_v9, %v3893_v37  ;;  %v3091_v27 = vadd.f32 %v3090_v53, %v2806_v44  ;;  %v2685_v15 = vmax.f32 %v1957_v52, 0.0  ;;  %v2460_v38 = vpop.f32.mrb[93].mxu1 }
 0x1b1   : > { %v2947_v49 = vadd.f32 %v2946_v32, %v2682_v18  ;;  %v1952_v54 = vadd.f32 %v4866_v9, %v1951_v61  ;;  %v2683_v25 = vmax.f32 %v1949_v41, 0.0  ;;  %v2461_v61 = vadd.f32 %v4866_v9, %v2460_v38  ;;  %v4021_v44 = vpop.f32.mrb[94].mxu1 }
 0x1b2   : > { %v2686_v6 = vmax.f32 %v1960_v63, 0.0  ;;  %v3092_v18 = vadd.f32 %v3091_v27, %v2807_v14  ;;  %v2463_v52 = vpop.f32.mrb[95].mxu1  ;;  %v2472_v29 = vadd.f32 %v4866_v9, %v4021_v44 }
 0x1b3   : > { %v2948_v16 = vrot.slane %v2947_v49, 4  ;;  %v2684_v1 = vmax.f32 %v1952_v54, 0.0  ;;  %v4024_v38 = vpop.f32.mrb[96].mxu1 }
 0x1b5   : > { %v2949_v31 = vadd.f32 %v2948_v16, %v2947_v49  ;;  %v2954_v46 = vadd.f32 %v2684_v1, %v2683_v25  ;;  %v3896_v34 = vpop.f32.mrb[100].mxu0  ;;  %v3093_v49 = vadd.f32 %v3092_v18, %v2808_v12  ;;  %v2469_v16 = vadd.f32 %v4866_v9, %v4020_v23  ;;  %v2476_v23 = vpop.f32.mrb[97].mxu1 }
 0x1b6   : > { %v1964_v19 = vpop.f32.mrb[101].mxu0  ;;  %v1973_v42 = vadd.f32 %v4866_v9, %v3896_v34  ;;  %v2811_v25 = vmax.f32 %v2461_v61, 0.0 }
 0x1b7   : > { %v2950_v32 = vrot.slane %v2949_v31, 2  ;;  %v2955_v37 = vadd.f32 %v2954_v46, %v2685_v15  ;;  %v1965_v43 = vadd.f32 %v4866_v9, %v1964_v19  ;;  %v3897_v41 = vpop.f32.mrb[102].mxu0  ;;  %v3094_v4 = vadd.f32 %v3093_v49, %v2809_v22 }
 0x1b8   : > { %v1967_v58 = vpop.f32.mrb[103].mxu0  ;;  %v1976_v14 = vadd.f32 %v4866_v9, %v3897_v41  ;;  %v2464_v46 = vadd.f32 %v4866_v9, %v2463_v52 }
 0x1b9   : > { %v2951_v54 = vadd.f32 %v2950_v32, %v2949_v31  ;;  %v2687_v63 = vmax.f32 %v1965_v43, 0.0  ;;  %v2956_v53 = vadd.f32 %v2955_v37, %v2686_v6  ;;  %v1968_v55 = vadd.f32 %v4866_v9, %v1967_v58 }
 0x1ba   : > { %v4947_v34 = vadd.f32 %v3094_v4, %v2810_v48  ;;  %v2689_v31 = vmax.f32 %v1973_v42, 0.0  ;;  %v2812_v18 = vmax.f32 %v2464_v46, 0.0  ;;  %v2690_v32 = vmax.f32 %v1976_v14, 0.0  ;;  %v4025_v48 = vpop.f32.mrb[98].mxu1 }
 0x1bb   : > { %v2952_v1 = vrot.slane %v2951_v54, 1  ;;  %v2957_v27 = vadd.f32 %v2956_v53, %v2687_v63  ;;  %v2688_v15 = vmax.f32 %v1968_v55, 0.0  ;;  %v2813_v37 = vmax.f32 %v2469_v16, 0.0  ;;  %v2479_v42 = vpop.f32.mrb[99].mxu1 }
 0x1bc   : > { %v3102_v49 = vadd.f32 %v2812_v18, %v2811_v25  ;;  %v2485_v16 = vadd.f32 %v4866_v9, %v4024_v38  ;;  %v4028_v38 = vpop.f32.mrb[100].mxu1 }
 0x1bd   : > { %v2953_v12 = vadd.f32 %v2952_v1, %v2951_v54  ;;  %v2958_v6 = vadd.f32 %v2957_v27, %v2688_v15  ;;  %v3900_v19 = vpop.f32.mrb[104].mxu0  ;;  %v2814_v54 = vmax.f32 %v2472_v29, 0.0  ;;  %v2477_v1 = vadd.f32 %v4866_v9, %v2476_v23 }
 0x1be   : > { %v1980_v22 = vpop.f32.mrb[105].mxu0  ;;  %v1989_v52 = vadd.f32 %v4866_v9, %v3900_v19  ;;  %v3103_v4 = vadd.f32 %v3102_v49, %v2813_v37  ;;  %v2488_v29 = vadd.f32 %v4866_v9, %v4025_v48  ;;  %v2817_v23 = vmax.f32 %v2485_v16, 0.0 }
 0x1bf   : > { %v3141_v43 = vmul.f32 0.00390625, %v2953_v12  ;;  %v2959_v41 = vadd.f32 %v2958_v6, %v2689_v31  ;;  %v1981_v61 = vadd.f32 %v4866_v9, %v1980_v22  ;;  %v3901_v58 = vpop.f32.mrb[106].mxu0  ;;  %v2815_v12 = vmax.f32 %v2477_v1, 0.0 }
 0x1c0   : > { %v1983_v44 = vpop.f32.mrb[107].mxu0  ;;  %v1992_v25 = vadd.f32 %v4866_v9, %v3901_v58  ;;  %v3104_v31 = vadd.f32 %v3103_v4, %v2814_v54  ;;  %v2480_v6 = vadd.f32 %v4866_v9, %v2479_v42  ;;  %v2693_v18 = vmax.f32 %v1989_v52, 0.0 }
 0x1c1   : > { %v3149_v63 = vpack.c.bf16 %v3141_v43, %v3141_v43  ;;  %v2691_v53 = vmax.f32 %v1981_v61, 0.0  ;;  %v2960_v55 = vadd.f32 %v2959_v41, %v2690_v32  ;;  %v1984_v14 = vadd.f32 %v4866_v9, %v1983_v44  ;;  %v2492_v61 = vpop.f32.mrb[101].mxu1 }
 0x1c2   : > { %v3105_v43 = vadd.f32 %v3104_v31, %v2815_v12  ;;  %v2816_v41 = vmax.f32 %v2480_v6, 0.0  ;;  %v2694_v58 = vmax.f32 %v1992_v25, 0.0  ;;  %v2493_v48 = vadd.f32 %v4866_v9, %v2492_v61  ;;  %v4029_v42 = vpop.f32.mrb[102].mxu1 }
 0x1c3   : > { %v3188_v27 = vunpack.c.l.b16 %v3149_v63  ;;  %v2961_v15 = vadd.f32 %v2960_v55, %v2691_v53  ;;  %v2692_v46 = vmax.f32 %v1984_v14, 0.0  ;;  %v2495_v52 = vpop.f32.mrb[103].mxu1 }
 0x1c4   : > { %v3106_v53 = vadd.f32 %v3105_v43, %v2816_v41  ;;  %v2496_v31 = vadd.f32 %v4866_v9, %v2495_v52  ;;  %v4032_v43 = vpop.f32.mrb[104].mxu1 }
 0x1c5   : > { %v4959_v19 = vsel %vm3196_vm3, %v3188_v27, %v4878_v13  ;;  %v2962_v32 = vadd.f32 %v2961_v15, %v2692_v46  ;;  %v3904_v22 = vpop.f32.mrb[108].mxu0  ;;  %v2818_v13 = vmax.f32 %v2488_v29, 0.0  ;;  %v2501_v27 = vadd.f32 %v4866_v9, %v4028_v38 }
 0x1c6   : > { %v1996_v37 = vpop.f32.mrb[109].mxu0  ;;  %v2005_v55 = vadd.f32 %v4866_v9, %v3904_v22  ;;  %v3107_v1 = vadd.f32 %v3106_v53, %v2817_v23  ;;  %v2819_v15 = vmax.f32 %v2493_v48, 0.0  ;;  %v2504_v29 = vadd.f32 %v4866_v9, %v4029_v42 }
 0x1c7   : > { %v2963_v49 = vadd.f32 %v2962_v32, %v2693_v18  ;;  %v1997_v44 = vadd.f32 %v4866_v9, %v1996_v37  ;;  %v3905_v54 = vpop.f32.mrb[110].mxu0  ;;  %v2820_v37 = vmax.f32 %v2496_v31, 0.0  ;;  %v2821_v61 = vmax.f32 %v2501_v27, 0.0 }
 0x1c8   : > { %v1999_v63 = vpop.f32.mrb[111].mxu0  ;;  %v2008_v46 = vadd.f32 %v4866_v9, %v3905_v54  ;;  %v3108_v6 = vadd.f32 %v3107_v1, %v2818_v13  ;;  %v2697_v18 = vmax.f32 %v2005_v55, 0.0  ;;  %v2822_v53 = vmax.f32 %v2504_v29, 0.0 }
 0x1c9   : > { %v2695_v14 = vmax.f32 %v1997_v44, 0.0  ;;  %v2964_v4 = vadd.f32 %v2963_v49, %v2694_v58  ;;  %v2000_v16 = vadd.f32 %v4866_v9, %v1999_v63  ;;  %v2508_v58 = vpop.f32.mrb[105].mxu1  ;;  %v2517_v27 = vadd.f32 %v4866_v9, %v4032_v43 }
 0x1ca   : > { %v3109_v23 = vadd.f32 %v3108_v6, %v2819_v15  ;;  %v2698_v38 = vmax.f32 %v2008_v46, 0.0  ;;  %v2509_v48 = vadd.f32 %v4866_v9, %v2508_v58  ;;  %v4033_v63 = vpop.f32.mrb[106].mxu1 }
 0x1cb   : > { %v2965_v25 = vadd.f32 %v2964_v4, %v2695_v14  ;;  %v2696_v12 = vmax.f32 %v2000_v16, 0.0  ;;  %v2511_v52 = vpop.f32.mrb[107].mxu1  ;;  %v2520_v29 = vadd.f32 %v4866_v9, %v4033_v63  ;;  %v2825_v58 = vmax.f32 %v2517_v27, 0.0 }
 0x1cc   : > { %v3110_v42 = vadd.f32 %v3109_v23, %v2820_v37  ;;  %v2823_v15 = vmax.f32 %v2509_v48, 0.0 }
 0x1cd   : > { %v2966_v32 = vadd.f32 %v2965_v25, %v2696_v12  ;;  %v3908_v22 = vpop.f32.mrb[112].mxu0  ;;  %v2512_v25 = vadd.f32 %v4866_v9, %v2511_v52 }
 0x1ce   : > { %v2012_v41 = vpop.f32.mrb[113].mxu0  ;;  %v2021_v55 = vadd.f32 %v4866_v9, %v3908_v22  ;;  %v3111_v1 = vadd.f32 %v3110_v42, %v2821_v61  ;;  %v2826_v42 = vmax.f32 %v2520_v29, 0.0 }
 0x1cf   : > { %v2967_v49 = vadd.f32 %v2966_v32, %v2697_v18  ;;  %v2013_v44 = vadd.f32 %v4866_v9, %v2012_v41  ;;  %v3909_v54 = vpop.f32.mrb[114].mxu0  ;;  %v2824_v18 = vmax.f32 %v2512_v25, 0.0  ;;  %v4036_v41 = vpop.f32.mrb[108].mxu1 }
 0x1d0   : > { %v2015_v13 = vpop.f32.mrb[115].mxu0  ;;  %v2024_v12 = vadd.f32 %v4866_v9, %v3909_v54  ;;  %v3112_v6 = vadd.f32 %v3111_v1, %v2822_v53  ;;  %v2701_v32 = vmax.f32 %v2021_v55, 0.0  ;;  %v2533_v27 = vadd.f32 %v4866_v9, %v4036_v41 }
 0x1d1   : > { %v2699_v14 = vmax.f32 %v2013_v44, 0.0  ;;  %v2968_v4 = vadd.f32 %v2967_v49, %v2698_v38  ;;  %v2016_v16 = vadd.f32 %v4866_v9, %v2015_v13  ;;  %v2524_v38 = vpop.f32.mrb[109].mxu1 }
 0x1d2   : > { %v3113_v61 = vadd.f32 %v3112_v6, %v2823_v15  ;;  %v2702_v43 = vmax.f32 %v2024_v12, 0.0  ;;  %v2525_v54 = vadd.f32 %v4866_v9, %v2524_v38  ;;  %v4037_v13 = vpop.f32.mrb[110].mxu1  ;;  %v2829_v38 = vmax.f32 %v2533_v27, 0.0 }
 0x1d3   : > { %v2969_v46 = vadd.f32 %v2968_v4, %v2699_v14  ;;  %v2700_v31 = vmax.f32 %v2016_v16, 0.0  ;;  %v2527_v52 = vpop.f32.mrb[111].mxu1  ;;  %v2536_v29 = vadd.f32 %v4866_v9, %v4037_v13 }
 0x1d4   : > { %v3114_v63 = vadd.f32 %v3113_v61, %v2824_v18  ;;  %v2827_v15 = vmax.f32 %v2525_v54, 0.0  ;;  %v2528_v25 = vadd.f32 %v4866_v9, %v2527_v52 }
 0x1d5   : > { %v2970_v22 = vadd.f32 %v2969_v46, %v2700_v31  ;;  %v3912_v37 = vpop.f32.mrb[116].mxu0 }
 0x1d6   : > { %v2028_v23 = vpop.f32.mrb[117].mxu0  ;;  %v2037_v55 = vadd.f32 %v4866_v9, %v3912_v37  ;;  %v3115_v1 = vadd.f32 %v3114_v63, %v2825_v58  ;;  %v2828_v18 = vmax.f32 %v2528_v25, 0.0  ;;  %v2830_v63 = vmax.f32 %v2536_v29, 0.0 }
 0x1d7   : > { %v2971_v49 = vadd.f32 %v2970_v22, %v2701_v32  ;;  %v2029_v44 = vadd.f32 %v4866_v9, %v2028_v23  ;;  %v3913_v48 = vpop.f32.mrb[118].mxu0  ;;  %v4040_v23 = vpop.f32.mrb[112].mxu1 }
 0x1d8   : > { %v2031_v53 = vpop.f32.mrb[119].mxu0  ;;  %v2040_v12 = vadd.f32 %v4866_v9, %v3913_v48  ;;  %v3116_v6 = vadd.f32 %v3115_v1, %v2826_v42  ;;  %v2705_v32 = vmax.f32 %v2037_v55, 0.0  ;;  %v2549_v27 = vadd.f32 %v4866_v9, %v4040_v23 }
 0x1d9   : > { %v2703_v14 = vmax.f32 %v2029_v44, 0.0  ;;  %v2972_v4 = vadd.f32 %v2971_v49, %v2702_v43  ;;  %v2032_v16 = vadd.f32 %v4866_v9, %v2031_v53  ;;  %v2540_v43 = vpop.f32.mrb[113].mxu1 }
 0x1da   : > { %v3117_v58 = vadd.f32 %v3116_v6, %v2827_v15  ;;  %v2706_v41 = vmax.f32 %v2040_v12, 0.0  ;;  %v2541_v48 = vadd.f32 %v4866_v9, %v2540_v43  ;;  %v4041_v53 = vpop.f32.mrb[114].mxu1  ;;  %v2833_v43 = vmax.f32 %v2549_v27, 0.0 }
 0x1db   : > { %v2973_v46 = vadd.f32 %v2972_v4, %v2703_v14  ;;  %v2704_v31 = vmax.f32 %v2032_v16, 0.0  ;;  %v2543_v52 = vpop.f32.mrb[115].mxu1  ;;  %v2552_v29 = vadd.f32 %v4866_v9, %v4041_v53 }
 0x1dc   : > { %v3118_v13 = vadd.f32 %v3117_v58, %v2828_v18  ;;  %v2831_v15 = vmax.f32 %v2541_v48, 0.0  ;;  %v2544_v25 = vadd.f32 %v4866_v9, %v2543_v52 }
 0x1dd   : > { %v2974_v22 = vadd.f32 %v2973_v46, %v2704_v31  ;;  %v3916_v37 = vpop.f32.mrb[120].mxu0 }
 0x1de   : > { %v2044_v61 = vpop.f32.mrb[121].mxu0  ;;  %v2053_v55 = vadd.f32 %v4866_v9, %v3916_v37  ;;  %v3119_v1 = vadd.f32 %v3118_v13, %v2829_v38  ;;  %v2832_v18 = vmax.f32 %v2544_v25, 0.0  ;;  %v2834_v13 = vmax.f32 %v2552_v29, 0.0 }
 0x1df   : > { %v2975_v49 = vadd.f32 %v2974_v22, %v2705_v32  ;;  %v2045_v44 = vadd.f32 %v4866_v9, %v2044_v61  ;;  %v3917_v54 = vpop.f32.mrb[122].mxu0  ;;  %v4044_v61 = vpop.f32.mrb[116].mxu1 }
 0x1e0   : > { %v2047_v42 = vpop.f32.mrb[123].mxu0  ;;  %v2056_v12 = vadd.f32 %v4866_v9, %v3917_v54  ;;  %v3120_v6 = vadd.f32 %v3119_v1, %v2830_v63  ;;  %v2709_v32 = vmax.f32 %v2053_v55, 0.0  ;;  %v2565_v27 = vadd.f32 %v4866_v9, %v4044_v61 }
 0x1e1   : > { %v2707_v14 = vmax.f32 %v2045_v44, 0.0  ;;  %v2976_v4 = vadd.f32 %v2975_v49, %v2706_v41  ;;  %v2048_v16 = vadd.f32 %v4866_v9, %v2047_v42  ;;  %v2556_v41 = vpop.f32.mrb[117].mxu1 }
 0x1e2   : > { %v3121_v38 = vadd.f32 %v3120_v6, %v2831_v15  ;;  %v2710_v23 = vmax.f32 %v2056_v12, 0.0  ;;  %v2557_v54 = vadd.f32 %v4866_v9, %v2556_v41  ;;  %v4045_v42 = vpop.f32.mrb[118].mxu1  ;;  %v2837_v41 = vmax.f32 %v2565_v27, 0.0 }
 0x1e3   : > { %v2977_v46 = vadd.f32 %v2976_v4, %v2707_v14  ;;  %v2708_v31 = vmax.f32 %v2048_v16, 0.0  ;;  %v2559_v52 = vpop.f32.mrb[119].mxu1  ;;  %v2568_v29 = vadd.f32 %v4866_v9, %v4045_v42 }
 0x1e4   : > { %v3122_v53 = vadd.f32 %v3121_v38, %v2832_v18  ;;  %v2835_v15 = vmax.f32 %v2557_v54, 0.0  ;;  %v2560_v25 = vadd.f32 %v4866_v9, %v2559_v52 }
 0x1e5   : > { %v2978_v22 = vadd.f32 %v2977_v46, %v2708_v31  ;;  %v3920_v37 = vpop.f32.mrb[124].mxu0 }
 0x1e6   : > { %v2060_v58 = vpop.f32.mrb[125].mxu0  ;;  %v2069_v55 = vadd.f32 %v4866_v9, %v3920_v37  ;;  %v3123_v1 = vadd.f32 %v3122_v53, %v2833_v43  ;;  %v2836_v18 = vmax.f32 %v2560_v25, 0.0  ;;  %v2838_v53 = vmax.f32 %v2568_v29, 0.0 }
 0x1e7   : > { %v2979_v49 = vadd.f32 %v2978_v22, %v2709_v32  ;;  %v2061_v44 = vadd.f32 %v4866_v9, %v2060_v58  ;;  %v3921_v48 = vpop.f32.mrb[126].mxu0  ;;  %v4048_v58 = vpop.f32.mrb[120].mxu1 }
 0x1e8   : > { %v2063_v63 = vpop.f32.mrb[127].mxu0  ;;  %v2072_v12 = vadd.f32 %v4866_v9, %v3921_v48  ;;  %v3124_v6 = vadd.f32 %v3123_v1, %v2834_v13  ;;  %v2713_v32 = vmax.f32 %v2069_v55, 0.0  ;;  %v2581_v1 = vadd.f32 %v4866_v9, %v4048_v58 }
 0x1e9   : > { %v2711_v14 = vmax.f32 %v2061_v44, 0.0  ;;  %v2980_v4 = vadd.f32 %v2979_v49, %v2710_v23  ;;  %v2064_v16 = vadd.f32 %v4866_v9, %v2063_v63  ;;  %v2572_v23 = vpop.f32.mrb[121].mxu1 }
 0x1ea   : > { %v3125_v43 = vadd.f32 %v3124_v6, %v2835_v15  ;;  %v2714_v61 = vmax.f32 %v2072_v12, 0.0  ;;  %v2573_v48 = vadd.f32 %v4866_v9, %v2572_v23  ;;  %v4049_v63 = vpop.f32.mrb[122].mxu1 }
 0x1eb   : > { %v2981_v46 = vadd.f32 %v2980_v4, %v2711_v14  ;;  %v2712_v31 = vmax.f32 %v2064_v16, 0.0  ;;  %v2575_v52 = vpop.f32.mrb[123].mxu1  ;;  %v2584_v29 = vadd.f32 %v4866_v9, %v4049_v63 }
 0x1ec   : > { %v3126_v42 = vadd.f32 %v3125_v43, %v2836_v18  ;;  %v2839_v27 = vmax.f32 %v2573_v48, 0.0  ;;  %v2576_v15 = vadd.f32 %v4866_v9, %v2575_v52  ;;  %v5014_v43 = vld [vmem:[%s5134_s2] ss:$0 sm:$0xff] }
 0x1ed   : > { %v2982_v22 = vadd.f32 %v2981_v46, %v2712_v31  ;;  %v3924_v37 = vpop.f32.mrb[128].mxu0  ;;  %v2096_v23 = vadd.f32 %v5014_v43, %v4669_v33 }
 0x1ee   : > { %v2076_v38 = vpop.f32.mrb[129].mxu0  ;;  %v2085_v14 = vadd.f32 %v4866_v9, %v3924_v37  ;;  %v3127_v16 = vadd.f32 %v3126_v42, %v2837_v41  ;;  %v2840_v18 = vmax.f32 %v2576_v15, 0.0  ;;  %v2841_v41 = vmax.f32 %v2581_v1, 0.0 }
 0x1ef   : > { %v2983_v49 = vadd.f32 %v2982_v22, %v2713_v32  ;;  %v2077_v44 = vadd.f32 %v4866_v9, %v2076_v38  ;;  %v3925_v54 = vpop.f32.mrb[130].mxu0  ;;  %v2093_v32 = vadd.f32 %v4866_v9, %v4662_v24  ;;  %v2101_v24 = vadd.f32 %v5014_v43, %v4658_v20 }
 0x1f0   : > { %v2079_v13 = vpop.f32.mrb[131].mxu0  ;;  %v2088_v12 = vadd.f32 %v4866_v9, %v3925_v54  ;;  %v3128_v6 = vadd.f32 %v3127_v16, %v2838_v53  ;;  %v2717_v37 = vmax.f32 %v2085_v14, 0.0  ;;  %v2842_v54 = vmax.f32 %v2584_v29, 0.0 }
 0x1f1   : > { %v2984_v55 = vadd.f32 %v2983_v49, %v2714_v61  ;;  %v2080_v4 = vadd.f32 %v4866_v9, %v2079_v13  ;;  %v2715_v46 = vmax.f32 %v2077_v44, 0.0  ;;  %v2719_v9 = vmax.f32 %v2093_v32, 0.0 }
 0x1f2   : > { %v3129_v58 = vadd.f32 %v3128_v6, %v2839_v27  ;;  %v2718_v49 = vmax.f32 %v2088_v12, 0.0  ;;  %v2104_v42 = vadd.f32 %v5014_v43, %v4666_v30  ;;  %v2720_v52 = vmax.f32 %v2096_v23, 0.0 }
 0x1f3   : > { %v2985_v25 = vrot.slane %v2984_v55, 4  ;;  %v2716_v31 = vmax.f32 %v2080_v4, 0.0  ;;  %v2721_v33 = vmax.f32 %v2101_v24, 0.0  ;;  %v2109_v16 = vadd.f32 %v5014_v43, %v4685_v51 }
 0x1f4   : > { %v3130_v48 = vadd.f32 %v3129_v58, %v2840_v18  ;;  %v2722_v15 = vmax.f32 %v2104_v42, 0.0  ;;  %v2112_v20 = vadd.f32 %v5014_v43, %v4692_v60  ;;  %v2117_v30 = vadd.f32 %v5014_v43, %v4678_v45 }
 0x1f5   : > { %v2986_v22 = vadd.f32 %v2985_v25, %v2984_v55  ;;  %v2991_v38 = vadd.f32 %v2716_v31, %v2715_v46  ;;  %v2723_v12 = vmax.f32 %v2109_v16, 0.0  ;;  %v2120_v29 = vadd.f32 %v5014_v43, %v4689_v57 }
 0x1f6   : > { %v3131_v53 = vadd.f32 %v3130_v48, %v2841_v41  ;;  %v2724_v18 = vmax.f32 %v2112_v20, 0.0  ;;  %v2128_v45 = vadd.f32 %v5014_v43, %v4713_v21  ;;  %v2133_v23 = vadd.f32 %v5014_v43, %v4702_v7 }
 0x1f7   : > { %v2987_v61 = vrot.slane %v2986_v22, 2  ;;  %v2992_v44 = vadd.f32 %v2991_v38, %v2717_v37  ;;  %v2125_v37 = vadd.f32 %v5014_v43, %v4706_v11  ;;  %v2726_v41 = vmax.f32 %v2120_v29, 0.0 }
 0x1f8   : > { %v5022_v4 = vadd.f32 %v3131_v53, %v2842_v54  ;;  %v2729_v11 = vmax.f32 %v2133_v23, 0.0  ;;  %v2144_v21 = vadd.f32 %v5014_v43, %v4734_v50  ;;  %v2149_v7 = vadd.f32 %v5014_v43, %v4722_v35 }
 0x1f9   : > { %v2988_v63 = vadd.f32 %v2987_v61, %v2986_v22  ;;  %v2993_v13 = vadd.f32 %v2992_v44, %v2718_v49  ;;  %v2725_v22 = vmax.f32 %v2117_v30, 0.0  ;;  %v2727_v57 = vmax.f32 %v2125_v37, 0.0 }
 0x1fa   : > { %v2136_v49 = vadd.f32 %v5014_v43, %v4710_v17  ;;  %v2728_v44 = vmax.f32 %v2128_v45, 0.0  ;;  %v2152_v17 = vadd.f32 %v5014_v43, %v4729_v47  ;;  %v2732_v53 = vmax.f32 %v2144_v21, 0.0 }
 0x1fb   : > { %v2989_v55 = vrot.slane %v2988_v63, 1  ;;  %v2994_v14 = vadd.f32 %v2993_v13, %v2719_v9  ;;  %v2160_v50 = vadd.f32 %v5014_v43, %v4749_v10  ;;  %v2165_v35 = vadd.f32 %v5014_v43, %v4742_v0 }
 0x1fc   : > { %v2730_v24 = vmax.f32 %v2136_v49, 0.0  ;;  %v2168_v47 = vadd.f32 %v5014_v43, %v4747_v8  ;;  %v2176_v10 = vadd.f32 %v5014_v43, %v4761_v39  ;;  %v2181_v0 = vadd.f32 %v5014_v43, %v4754_v26 }
 0x1fd   : > { %v2990_v1 = vadd.f32 %v2989_v55, %v2988_v63  ;;  %v2995_v27 = vadd.f32 %v2994_v14, %v2720_v52  ;;  %v2733_v52 = vmax.f32 %v2149_v7, 0.0  ;;  %v2734_v14 = vmax.f32 %v2152_v17, 0.0 }
 0x1fe   : > { %v2737_v20 = vmax.f32 %v2165_v35, 0.0  ;;  %v2184_v8 = vadd.f32 %v5014_v43, %v4759_v36  ;;  %v2192_v26 = vadd.f32 %v5014_v43, %v4773_v5 }
 0x1ff   : > { %v3142_v25 = vmul.f32 0.00390625, %v2990_v1  ;;  %v2996_v46 = vadd.f32 %v2995_v27, %v2721_v33  ;;  %v2736_v27 = vmax.f32 %v2160_v50, 0.0 }
 0x200   : > { %v2742_v37 = vmax.f32 %v2184_v8, 0.0 }
 0x201   : > { %v3150_v31 = vpack.c.bf16 %v3142_v25, %v3142_v25  ;;  %v2997_v6 = vadd.f32 %v2996_v46, %v2722_v15  ;;  %v2738_v46 = vmax.f32 %v2168_v47, 0.0 }
 0x203   : > { %v3189_v51 = vunpack.c.l.b16 %v3150_v31  ;;  %v2998_v32 = vadd.f32 %v2997_v6, %v2723_v12  ;;  %v2740_v6 = vmax.f32 %v2176_v10, 0.0 }
 0x205   : > { %v5035_v60 = vsel %vm3198_vm4, %v3189_v51, %v4959_v19  ;;  %v2999_v38 = vadd.f32 %v2998_v32, %v2724_v18  ;;  %v2141_v19 = vadd.f32 %v5014_v43, %v4726_v40  ;;  %v2157_v40 = vadd.f32 %v5014_v43, %v4744_v2 }
 0x206   : > { %v2173_v2 = vadd.f32 %v5014_v43, %v4756_v28  ;;  %v3059_v18 = vrot.slane %v4861_v62, 4  ;;  %v2741_v51 = vmax.f32 %v2181_v0, 0.0  ;;  %v2189_v28 = vadd.f32 %v5014_v43, %v4768_v59 }
 0x207   : > { %v3000_v58 = vadd.f32 %v2999_v38, %v2725_v22  ;;  %v2731_v63 = vmax.f32 %v2141_v19, 0.0  ;;  %v2735_v16 = vmax.f32 %v2157_v40, 0.0  ;;  %v3096_v32 = vrot.slane %v4947_v34, 4 }
 0x208   : > { %v2739_v12 = vmax.f32 %v2173_v2, 0.0  ;;  %v3133_v22 = vrot.slane %v5022_v4, 4  ;;  %v3060_v36 = vadd.f32 %v3059_v18, %v4861_v62  ;;  %v2743_v45 = vmax.f32 %v2189_v28, 0.0 }
 0x209   : > { %v3001_v61 = vadd.f32 %v3000_v58, %v2726_v41  ;;  %v2197_v41 = vadd.f32 %v5014_v43, %v4766_v56  ;;  %v3097_v58 = vadd.f32 %v3096_v32, %v4947_v34 }
 0x20a   : > { %v3134_v59 = vadd.f32 %v3133_v22, %v5022_v4 }
 0x20b   : > { %v3002_v54 = vadd.f32 %v3001_v61, %v2727_v57  ;;  %v2200_v57 = vadd.f32 %v5014_v43, %v4771_v3  ;;  %v2744_v61 = vmax.f32 %v2192_v26, 0.0  ;;  %v3098_v5 = vrot.slane %v3097_v58, 2 }
 0x20c   : > { %v3135_v19 = vrot.slane %v3134_v59, 2 }
 0x20d   : > { %v3003_v48 = vadd.f32 %v3002_v54, %v2728_v44  ;;  %v3061_v44 = vrot.slane %v3060_v36, 2  ;;  %v2745_v54 = vmax.f32 %v2197_v41, 0.0  ;;  %v2746_v62 = vmax.f32 %v2200_v57, 0.0 }
 0x20e   : > { %v3099_v56 = vadd.f32 %v3098_v5, %v3097_v58 }
 0x20f   : > { %v3004_v9 = vadd.f32 %v3003_v48, %v2729_v11 }
 0x211   : > { %v3005_v13 = vadd.f32 %v3004_v9, %v2730_v24  ;;  %v3062_v24 = vadd.f32 %v3061_v44, %v3060_v36  ;;  %v3136_v9 = vadd.f32 %v3135_v19, %v3134_v59 }
 0x213   : > { %v3006_v42 = vadd.f32 %v3005_v13, %v2731_v63  ;;  %v3063_v7 = vrot.slane %v3062_v24, 1  ;;  %v3100_v63 = vrot.slane %v3099_v56, 1  ;;  %v3137_v13 = vrot.slane %v3136_v9, 1 }
 0x215   : > { %v3007_v55 = vadd.f32 %v3006_v42, %v2732_v53  ;;  %v3064_v3 = vadd.f32 %v3063_v7, %v3062_v24  ;;  %v3101_v43 = vadd.f32 %v3100_v63, %v3099_v56  ;;  %v3138_v42 = vadd.f32 %v3137_v13, %v3136_v9 }
 0x217   : > { %v3008_v33 = vadd.f32 %v3007_v55, %v2733_v52  ;;  %v3144_v40 = vmul.f32 0.00390625, %v3064_v3  ;;  %v3145_v55 = vmul.f32 0.00390625, %v3101_v43  ;;  %v3146_v50 = vmul.f32 0.00390625, %v3138_v42 }
 0x219   : > { %v3009_v1 = vadd.f32 %v3008_v33, %v2734_v14  ;;  %v3152_v35 = vpack.c.bf16 %v3144_v40, %v3144_v40  ;;  %v3154_v47 = vpack.c.bf16 %v3146_v50, %v3146_v50 }
 0x21b   : > { %v3010_v15 = vadd.f32 %v3009_v1, %v2735_v16  ;;  %v3153_v16 = vpack.c.bf16 %v3145_v55, %v3145_v55 }
 0x21d   : > { %v3011_v25 = vadd.f32 %v3010_v15, %v2736_v27  ;;  %v3191_v15 = vunpack.c.l.b16 %v3152_v35 }
 0x21f   : > { %v3012_v30 = vadd.f32 %v3011_v25, %v2737_v20  ;;  %v3192_v20 = vunpack.c.l.b16 %v3153_v16  ;;  %v3193_v25 = vunpack.c.l.b16 %v3154_v47 }
 0x221   : > { %v3013_v31 = vadd.f32 %v3012_v30, %v2738_v46 }
 0x223   : > { %v3014_v29 = vadd.f32 %v3013_v31, %v2739_v12  ;;  %v3638_v12 = vld [vmem:[%s5136_s4] ss:$0 sm:$0xff] }
 0x225   : > { %v3015_v39 = vadd.f32 %v3014_v29, %v2740_v6 }
 0x227   : > { %v3016_v38 = vadd.f32 %v3015_v39, %v2741_v51 }
 0x229   : > { %v3017_v23 = vadd.f32 %v3016_v38, %v2742_v37 }
 0x22b   : > { %v3018_v49 = vadd.f32 %v3017_v23, %v2743_v45 }
 0x22d   : > { %v3019_v11 = vadd.f32 %v3018_v49, %v2744_v61 }
 0x22f   : > { %v3020_v48 = vadd.f32 %v3019_v11, %v2745_v54 }
 0x231   : > { %v3021_v21 = vadd.f32 %v3020_v48, %v2746_v62 }
 0x233   : > { %v3022_v34 = vrot.slane %v3021_v21, 4 }
 0x235   : > { %v3023_v4 = vadd.f32 %v3022_v34, %v3021_v21 }
 0x237   : > { %v3024_v17 = vrot.slane %v3023_v4, 2 }
 0x239   : > { %v3025_v53 = vadd.f32 %v3024_v17, %v3023_v4 }
 0x23b   : > { %v3026_v52 = vrot.slane %v3025_v53, 1 }
 0x23d   : > { %v3027_v14 = vadd.f32 %v3026_v52, %v3025_v53 }
 0x23f   : > { %v3143_v33 = vmul.f32 0.00390625, %v3027_v14 }
 0x241   : > { %v3151_v1 = vpack.c.bf16 %v3143_v33, %v3143_v33 }
 0x243   : > { %v3190_v27 = vunpack.c.l.b16 %v3151_v1 }
 0x245   : > { %v3201_v2 = vsel %vm3200_vm5, %v3190_v27, %v5035_v60 }
 0x246   : > { %v3203_v46 = vsel %vm3202_vm6, %v3191_v15, %v3201_v2 }
 0x247   : > { %v3205_v10 = vsel %vm3204_vm7, %v3192_v20, %v3203_v46 }
 0x248   : > { %v3207_v30 = vsel %vm3206_vm8, %v3193_v25, %v3205_v10 }
 0x249   : > { %v3208_v0 = vpack.c.b16 %v3207_v30, %v3207_v30 }
 0x24b   : > { %4067 = vmatmul.mubr.bf16.vlgmr.msra.gmra.mrb[124].mxu1 %v3208_v0 }
 0x31e   : > { %v3292_v31 = vpop.f32.mrb[124].mxu1 }
 0x31f   : > { %v3293_v8 = vadd.f32 %v3638_v12, %v3292_v31  ;;  %v4068_v60 = vpop.f32.mrb[125].mxu1 }
 0x320   : > { %v3295_v6 = vpop.f32.mrb[126].mxu1 }
 0x321   : > { %3298 = vst [vmem:[%s218_s9] sm:$0xff] %v3293_v8  ;;  %v4069_v29 = vpop.f32.mrb[127].mxu1 }
 0x322   : > { %4268 = shalt.err (!%p4265_p3)
}
 0x323   : > { %s4269_s23 = scalar_lea.hbm %s5090_s13, 128  ;;  %s4273_s30 = scalar_lea.hbm %s5137_s5, 256 }
 0x324   : > { %p4270_p4 = scmp.ne.s32.totalorder %s5090_s13, %s4269_s23  ;;  %p4274_p9 = scmp.lt.u32.totalorder %s5090_s13, %s5137_s5 }
 0x325   : > { %p4275_p10 = scmp.lt.u32.totalorder %s4273_s30, %s4269_s23  ;;  %p4277_p12 = scmp.lt.u32.totalorder %s4269_s23, %s5090_s13 }
 0x326   : > { %p4271_p7 = pnand %p4270_p4, %p4390_p5 }
 0x327   : > { %p4276_p11 = por %p4275_p10, %p4274_p9 }
 0x328   : > { %p4272_p8 = pneg %p4271_p7 }
 0x329   : > { %p4278_p13 = por %p4277_p12, %p4276_p11 }
 0x32b   : > { %p4279_p0 = pnand %p4278_p13, %p4272_p8 }
 0x32d   : > { %4282 = shalt.err (!%p4279_p0)
}
 0x32e   : > { %4074 = dma.vmem_to_hbm [thread:$0]  (%p4390_p5), %s5092_s10, 128, %s5090_s13, %s3300_s14  }
 0x32f PF: > { %p4080_p1 = scmp.ge.s32.totalorder %s4317_s21, 2  ;;  %s3325_s8 = sand.u32 1, %s4305_s18  }
 0x330   : > { %s3326_s9 = scalar_lea.sflag [#allocation3], %s3325_s8 }
 0x331   : > { %p4077_p2 = pnand %p4080_p1, %p4394_p6 }
 0x333   : > { %4300 = dma.done.wait (!%p4077_p2), %s3326_s9, 128  }
 0x334   : > { %4302 = vsyncadd (!%p4077_p2), %s3326_s9, 4294967168  ;;  %p15_p3 = scmp.ge.s32.totalorder %s4377_s24, 4   ;;  %s5140_s18 = smov %s4309_s19 }
 0x335   : > { %s5141_s19 = smov %s4313_s20  ;;  %s5142_s20 = smov %s4388_s27 }
 0x336   : > { %s5143_s21 = smov %s4377_s24  ;;  %17 = sbr.rel (!%p15_p3) target bundleno = 3 (0x3), region = 75 }
 0x33d   :  { %3331 = vsyncpa [#allocation3], 1 }
 0x33e   :  { %3333 = vsyncpa [#allocation3 + $0x1], 1 }

</bundles_post_ra>
